<compile_context>
chip_gen: v5e
topology: v5e:2x2
jax: 0.10.0
libtpu: 0.0.40
codegen_flags: <defaults>
</compile_context>

<pallas_src>
import jax
import jax.numpy as jnp
from jax.experimental import pallas as pl
from jax.experimental.pallas import tpu as pltpu

F_IN = 784        # true input feature dim (full-array-dim block, no lane pad)
H1 = 256
H2 = 128
NC_PAD = 128      # lane-dense padded num_classes (kept: unmasked vst stores)


def mlp_kernel(x_ref, w1_ref, b1_ref, w2_ref, b2_ref, w3_ref, b3_ref, o_ref):
    # x/w* are bf16 (native MXU input dtype); accumulate in f32 on the MXU.
    # Bias adds + ReLU stay f32 on the VPU (v5e has no bf16 VALU).
    h1 = jnp.dot(x_ref[...], w1_ref[...], preferred_element_type=jnp.float32)
    h1 = jnp.maximum(h1 + b1_ref[...], 0.0)

    h2 = jnp.dot(h1.astype(jnp.bfloat16), w2_ref[...],
                 preferred_element_type=jnp.float32)
    h2 = jnp.maximum(h2 + b2_ref[...], 0.0)

    h3 = jnp.dot(h2.astype(jnp.bfloat16), w3_ref[...],
                 preferred_element_type=jnp.float32)
    # TODO(synk): emit bf16 output here if downstream tolerates it (halves writeback).
    o_ref[...] = (h3 + b3_ref[...]).astype(o_ref.dtype)


def prepare_params(params):
    """One-time prep: pad fc3 to 128 lanes and cast matmul weights to bf16."""
    nc = params["w3"].shape[1]
    w3 = jnp.zeros((H2, NC_PAD), jnp.float32).at[:, :nc].set(params["w3"])
    b3 = jnp.zeros((1, NC_PAD), jnp.float32).at[:, :nc].set(params["b3"])
    return {
        "w1": params["w1"].astype(jnp.bfloat16),     # (784, 256)
        "b1": params["b1"].astype(jnp.float32),
        "w2": params["w2"].astype(jnp.bfloat16),     # (256, 128)
        "b2": params["b2"].astype(jnp.float32),
        "w3": w3.astype(jnp.bfloat16),               # (128, 128) lane-padded
        "b3": b3,
        "num_classes": nc,
    }


def _choose_tb(B):
    """Batch tile: multiple of 128, clamped to [128, 512].

    Aims for >=2 grid steps when B > 128 (v7x megacore sharding) while keeping
    tiles big enough to amortize the ~0.35 us per-grid-step overhead.
    """
    half = -(-B // 2)                         # ceil(B / 2)
    tb = ((half + 127) // 128) * 128          # round up to a 128-row tile
    return max(128, min(512, tb))


def net_forward(x, prepped):
    """x: (B, 784) float32.  prepped: output of prepare_params."""
    B = x.shape[0]
    nc = prepped["num_classes"]
    TB = _choose_tb(B)
    B_pad = pl.cdiv(B, TB) * TB

    # Single fused bf16 pad pass (batch only; K=784 stays unpadded).
    x_p = jnp.pad(x.astype(jnp.bfloat16), ((0, B_pad - B), (0, 0)))

    grid = (B_pad // TB,)
    out = pl.pallas_call(
        mlp_kernel,
        out_shape=jax.ShapeDtypeStruct((B_pad, NC_PAD), jnp.float32),
        grid=grid,
        in_specs=[
            # activations: one batch tile per grid step (double-buffered);
            # K=784 is the full array dim, so a non-128-multiple block is legal.
            pl.BlockSpec((TB, F_IN), lambda i: (i, 0)),
            # weights / biases: same block every step -> stay VMEM-resident
            pl.BlockSpec((F_IN, H1), lambda i: (0, 0)),
            pl.BlockSpec((1, H1), lambda i: (0, 0)),
            pl.BlockSpec((H1, H2), lambda i: (0, 0)),
            pl.BlockSpec((1, H2), lambda i: (0, 0)),
            pl.BlockSpec((H2, NC_PAD), lambda i: (0, 0)),
            pl.BlockSpec((1, NC_PAD), lambda i: (0, 0)),
        ],
        out_specs=pl.BlockSpec((TB, NC_PAD), lambda i: (i, 0)),
        compiler_params=pltpu.CompilerParams(
            dimension_semantics=("parallel",),   # megacore sharding on v7x
        ),
    )(x_p, prepped["w1"], prepped["b1"], prepped["w2"], prepped["b2"],
      prepped["w3"], prepped["b3"])

    # Strip batch padding and lane padding outside the kernel.
    return out[:B, :nc]


def init_params(key, num_classes):
    """Deterministic init mimicking PyTorch nn.Linear default (U[-1/sqrt(fan_in), +])."""
    def linear(key, fan_in, fan_out):
        kw, kb = jax.random.split(key)
        bound = 1.0 / jnp.sqrt(float(fan_in))
        # stored pre-transposed: (fan_in, fan_out)
        w = jax.random.uniform(kw, (fan_in, fan_out), jnp.float32, -bound, bound)
        b = jax.random.uniform(kb, (1, fan_out), jnp.float32, -bound, bound)
        return w, b

    k1, k2, k3 = jax.random.split(key, 3)
    w1, b1 = linear(k1, F_IN, H1)
    w2, b2 = linear(k2, H1, H2)
    w3, b3 = linear(k3, H2, num_classes)
    return {"w1": w1, "b1": b1, "w2": w2, "b2": b2, "w3": w3, "b3": b3}


def _ref_forward(x, params):
    """Pure-JAX f32 reference with the original PyTorch semantics."""
    h = jnp.maximum(x @ params["w1"] + params["b1"], 0.0)
    h = jnp.maximum(h @ params["w2"] + params["b2"], 0.0)
    return h @ params["w3"] + params["b3"]


if __name__ == "__main__":
    num_classes = 10

    key = jax.random.PRNGKey(0)
    kx1, kx2, kp = jax.random.split(key, 3)
    params = init_params(kp, num_classes)
    prepped = prepare_params(params)

    # --- tiny serving batch: padded up to one 128-row tile ---
    x_small = jax.random.normal(kx1, (8, F_IN), jnp.float32)
    out_small = jax.block_until_ready(net_forward(x_small, prepped))
    assert out_small.shape == (8, num_classes)

    ref = _ref_forward(x_small, params)
    assert jnp.allclose(out_small, ref, atol=5e-2, rtol=5e-2), (
        f"max abs err {jnp.max(jnp.abs(out_small - ref))}")

    # Tighter check against a reference that mimics the kernel's bf16-in/f32-acc math.
    def bf16_dot(a, w):
        return jnp.dot(a.astype(jnp.bfloat16), w, preferred_element_type=jnp.float32)
    ref2 = jnp.maximum(bf16_dot(x_small, prepped["w1"]) + params["b1"], 0.0)
    ref2 = jnp.maximum(bf16_dot(ref2, prepped["w2"]) + params["b2"], 0.0)
    ref2 = bf16_dot(ref2, prepped["w3"][:, :num_classes]) + params["b3"]
    assert jnp.allclose(out_small, ref2, atol=2e-3, rtol=2e-3), (
        f"max abs err vs bf16 ref {jnp.max(jnp.abs(out_small - ref2))}")

    # --- batch that exercises multiple grid steps (TB=128, grid=(2,)) ---
    x_multi = jax.random.normal(kx2, (200, F_IN), jnp.float32)
    out_multi = jax.block_until_ready(net_forward(x_multi, prepped))
    assert out_multi.shape == (200, num_classes)
    ref_multi = _ref_forward(x_multi, params)
    assert jnp.allclose(out_multi, ref_multi, atol=5e-2, rtol=5e-2), (
        f"max abs err (multi-tile) {jnp.max(jnp.abs(out_multi - ref_multi))}")

    print("KERNEL_OK")
</pallas_src>

<mosaic_0001>
module attributes {stable_mosaic.version = 11 : i64} {
  func.func @mlp_kernel(%arg0: i32, %arg1: memref<128x784xbf16, #tpu.memory_space<vmem>>, %arg2: memref<784x256xbf16, #tpu.memory_space<vmem>>, %arg3: memref<1x256xf32, #tpu.memory_space<vmem>>, %arg4: memref<256x128xbf16, #tpu.memory_space<vmem>>, %arg5: memref<1x128xf32, #tpu.memory_space<vmem>>, %arg6: memref<128x128xbf16, #tpu.memory_space<vmem>>, %arg7: memref<1x128xf32, #tpu.memory_space<vmem>>, %arg8: memref<128x128xf32, #tpu.memory_space<vmem>>) attributes {dimension_semantics = [#tpu.dimension_semantics<parallel>], iteration_bounds = array<i64: 1>, scalar_prefetch = 0 : i64, scratch_operands = 0 : i64, tpu.core_type = #tpu.core_type<tc>, window_params = [{transform_indices = @transform_0, window_bounds = array<i64: 128, 784>}, {pipeline_mode = #tpu.pipeline_mode<synchronous>, transform_indices = @transform_1, window_bounds = array<i64: 784, 256>}, {pipeline_mode = #tpu.pipeline_mode<synchronous>, transform_indices = @transform_2, window_bounds = array<i64: 1, 256>}, {pipeline_mode = #tpu.pipeline_mode<synchronous>, transform_indices = @transform_3, window_bounds = array<i64: 256, 128>}, {pipeline_mode = #tpu.pipeline_mode<synchronous>, transform_indices = @transform_4, window_bounds = array<i64: 1, 128>}, {pipeline_mode = #tpu.pipeline_mode<synchronous>, transform_indices = @transform_5, window_bounds = array<i64: 128, 128>}, {pipeline_mode = #tpu.pipeline_mode<synchronous>, transform_indices = @transform_6, window_bounds = array<i64: 1, 128>}, {transform_indices = @transform_7, window_bounds = array<i64: 128, 128>}]} {
    %c0 = arith.constant 0 : index
    %c0_0 = arith.constant 0 : index
    %0 = vector.load %arg1[%c0, %c0_0] : memref<128x784xbf16, #tpu.memory_space<vmem>>, vector<128x784xbf16>
    %c0_1 = arith.constant 0 : index
    %c0_2 = arith.constant 0 : index
    %1 = vector.load %arg2[%c0_1, %c0_2] : memref<784x256xbf16, #tpu.memory_space<vmem>>, vector<784x256xbf16>
    %cst = arith.constant dense<0.000000e+00> : vector<128x256xf32>
    %2 = tpu.matmul %0, %1, %cst {dimension_numbers = #tpu.dot_dimension_numbers<[1], [0], [0], [1], [0, 0, 1, 1], [], []>} : vector<128x784xbf16>, vector<784x256xbf16>, vector<128x256xf32> -> vector<128x256xf32>
    %c0_3 = arith.constant 0 : index
    %c0_4 = arith.constant 0 : index
    %3 = vector.load %arg3[%c0_3, %c0_4] : memref<1x256xf32, #tpu.memory_space<vmem>>, vector<1x256xf32>
    %4 = vector.broadcast %3 : vector<1x256xf32> to vector<128x256xf32>
    %5 = arith.addf %2, %4 : vector<128x256xf32>
    %cst_5 = arith.constant 0.000000e+00 : f32
    %6 = vector.broadcast %cst_5 : f32 to vector<128x256xf32>
    %7 = arith.maximumf %5, %6 : vector<128x256xf32>
    %8 = arith.truncf %7 : vector<128x256xf32> to vector<128x256xbf16>
    %c0_6 = arith.constant 0 : index
    %c0_7 = arith.constant 0 : index
    %9 = vector.load %arg4[%c0_6, %c0_7] : memref<256x128xbf16, #tpu.memory_space<vmem>>, vector<256x128xbf16>
    %cst_8 = arith.constant dense<0.000000e+00> : vector<128x128xf32>
    %10 = tpu.matmul %8, %9, %cst_8 {dimension_numbers = #tpu.dot_dimension_numbers<[1], [0], [0], [1], [0, 0, 1, 1], [], []>} : vector<128x256xbf16>, vector<256x128xbf16>, vector<128x128xf32> -> vector<128x128xf32>
    %c0_9 = arith.constant 0 : index
    %c0_10 = arith.constant 0 : index
    %11 = vector.load %arg5[%c0_9, %c0_10] : memref<1x128xf32, #tpu.memory_space<vmem>>, vector<1x128xf32>
    %12 = vector.broadcast %11 : vector<1x128xf32> to vector<128x128xf32>
    %13 = arith.addf %10, %12 : vector<128x128xf32>
    %cst_11 = arith.constant 0.000000e+00 : f32
    %14 = vector.broadcast %cst_11 : f32 to vector<128x128xf32>
    %15 = arith.maximumf %13, %14 : vector<128x128xf32>
    %16 = arith.truncf %15 : vector<128x128xf32> to vector<128x128xbf16>
    %c0_12 = arith.constant 0 : index
    %c0_13 = arith.constant 0 : index
    %17 = vector.load %arg6[%c0_12, %c0_13] : memref<128x128xbf16, #tpu.memory_space<vmem>>, vector<128x128xbf16>
    %cst_14 = arith.constant dense<0.000000e+00> : vector<128x128xf32>
    %18 = tpu.matmul %16, %17, %cst_14 {dimension_numbers = #tpu.dot_dimension_numbers<[1], [0], [0], [1], [0, 0, 1, 1], [], []>} : vector<128x128xbf16>, vector<128x128xbf16>, vector<128x128xf32> -> vector<128x128xf32>
    %c0_15 = arith.constant 0 : index
    %c0_16 = arith.constant 0 : index
    %19 = vector.load %arg7[%c0_15, %c0_16] : memref<1x128xf32, #tpu.memory_space<vmem>>, vector<1x128xf32>
    %20 = vector.broadcast %19 : vector<1x128xf32> to vector<128x128xf32>
    %21 = arith.addf %18, %20 : vector<128x128xf32>
    %c0_17 = arith.constant 0 : index
    %c0_18 = arith.constant 0 : index
    %22 = vector.load %arg8[%c0_17, %c0_18] : memref<128x128xf32, #tpu.memory_space<vmem>>, vector<128x128xf32>
    tpu.vector_store %arg8[%c0_17, %c0_18], %21 {strides = array<i32>} : memref<128x128xf32, #tpu.memory_space<vmem>>, vector<128x128xf32>,
    return
  }
  func.func @transform_0(%arg0: i32) -> (i32, i32) {
    %c0_i32 = arith.constant 0 : i32
    %c0_i32_0 = arith.constant 0 : i32
    return %arg0, %c0_i32 : i32, i32
  }
  func.func @transform_1(%arg0: i32) -> (i32, i32) {
    %c0_i32 = arith.constant 0 : i32
    %c0_i32_0 = arith.constant 0 : i32
    %c0_i32_1 = arith.constant 0 : i32
    return %c0_i32, %c0_i32_0 : i32, i32
  }
  func.func @transform_2(%arg0: i32) -> (i32, i32) {
    %c0_i32 = arith.constant 0 : i32
    %c0_i32_0 = arith.constant 0 : i32
    %c0_i32_1 = arith.constant 0 : i32
    return %c0_i32, %c0_i32_0 : i32, i32
  }
  func.func @transform_3(%arg0: i32) -> (i32, i32) {
    %c0_i32 = arith.constant 0 : i32
    %c0_i32_0 = arith.constant 0 : i32
    %c0_i32_1 = arith.constant 0 : i32
    return %c0_i32, %c0_i32_0 : i32, i32
  }
  func.func @transform_4(%arg0: i32) -> (i32, i32) {
    %c0_i32 = arith.constant 0 : i32
    %c0_i32_0 = arith.constant 0 : i32
    %c0_i32_1 = arith.constant 0 : i32
    return %c0_i32, %c0_i32_0 : i32, i32
  }
  func.func @transform_5(%arg0: i32) -> (i32, i32) {
    %c0_i32 = arith.constant 0 : i32
    %c0_i32_0 = arith.constant 0 : i32
    %c0_i32_1 = arith.constant 0 : i32
    return %c0_i32, %c0_i32_0 : i32, i32
  }
  func.func @transform_6(%arg0: i32) -> (i32, i32) {
    %c0_i32 = arith.constant 0 : i32
    %c0_i32_0 = arith.constant 0 : i32
    %c0_i32_1 = arith.constant 0 : i32
    return %c0_i32, %c0_i32_0 : i32, i32
  }
  func.func @transform_7(%arg0: i32) -> (i32, i32) {
    %c0_i32 = arith.constant 0 : i32
    %c0_i32_0 = arith.constant 0 : i32
    return %arg0, %c0_i32 : i32, i32
  }
}

</mosaic_0001>

<bundles_post_ra>
// kernel: tpu_custom_call.1
= control target key start
LH: loop header
LB: loop body
LE: loop exit
PB: predicated region body
PF: predicated region fallthrough
CT: control target
= control target key end

     0   :  { %12 = vsyncpa [#allocation3], 0  ;;  %s4693_s0 = inlined_call_operand.vmem [shape: bf16[128,784], index: 0, kind: input, shape index: {}]   ;;  %s4694_s1 = inlined_call_operand.vmem [shape: bf16[784,256], index: 1, kind: input, shape index: {}]   ;;  %s4695_s2 = inlined_call_operand.vmem [shape: f32[1,256], index: 2, kind: input, shape index: {}]   ;;  %s4696_s3 = inlined_call_operand.hbm [shape: bf16[256,128], index: 3, kind: input, shape index: {}]   ;;  %s4697_s4 = inlined_call_operand.vmem [shape: f32[1,128], index: 4, kind: input, shape index: {}]   ;;  %s4698_s5 = inlined_call_operand.hbm [shape: bf16[128,128], index: 5, kind: input, shape index: {}]   ;;  %s4699_s6 = inlined_call_operand.vmem [shape: f32[1,128], index: 6, kind: input, shape index: {}]   ;;  %s4700_s7 = inlined_call_operand.hbm [shape: f32[128,128], index: 7, kind: output, shape index: {}]  }
   0x1   :  { %13 = vsyncpa [#allocation6], 0 }
   0x2   :  { %14 = vsyncpa [#allocation4], 0  ;;  %s25_s26 = sshll.u32 %s4696_s3, 4  ;;  %s3181_s27 = smov [#allocation2]   ;;  %s26_s26 = int_to_ptr.hbm [resolvable:$true] %s25_s26 }
   0x3   :  { %s27_s28 = sshll.u32 %s3181_s27, 4  ;;  %s40_s8 = sshll.u32 %s4698_s5, 4  ;;  %s28_s28 = int_to_ptr.vmem [resolvable:$true] %s27_s28  ;;  %s41_s8 = int_to_ptr.hbm [resolvable:$true] %s40_s8 }
   0x4   :  { %s3182_s9 = smov 64   ;;  %s3183_s10 = smov 4  }
   0x5   :  { %33 = dma.hbm_to_vmem [thread:$0]  %s26_s26, 2048, %s28_s28, [#allocation3], %s3182_s9, %s3182_s9, %s3183_s10  }
   0x6   :  { %s3184_s11 = smov [#allocation5]  }
   0x7   :  { %s42_s12 = sshll.u32 %s3184_s11, 4  ;;  %s43_s12 = int_to_ptr.vmem [resolvable:$true] %s42_s12 }
   0x8   :  { %48 = dma.hbm_to_vmem [thread:$0]  %s41_s8, 1024, %s43_s12, [#allocation6], %s3182_s9, %s3182_s9, %s3183_s10  }
   0x9   :  { %3175 = dma.done.wait [#allocation3], 2048  }
   0xa   :  { %3176 = vsyncadd [#allocation3], 4294965248 }
   0xb   :  { %3177 = dma.done.wait [#allocation6], 1024  }
   0xc   :  { %3178 = vsyncadd [#allocation6], 4294966272  ;;  %v2446_v0 = vld [vmem:[%s4694_s1 + $0x70] sm:$0xf]  ;;  %v2963_v1 = vld [vmem:[%s4694_s1 + $0x74] sm:$0xf0] }
   0xd   :  { %v2438_v2 = vld [vmem:[%s4694_s1 + $0x60] sm:$0xf]  ;;  %v2447_v3 = vor.u32 %v2963_v1, %v2446_v0  ;;  %v2961_v4 = vld [vmem:[%s4694_s1 + $0x64] sm:$0xf0]  ;;  %v2430_v6 = vld [vmem:[%s4694_s1 + $0x50] sm:$0xf] }
   0xe   :  { %v2439_v5 = vor.u32 %v2961_v4, %v2438_v2  ;;  %v2959_v7 = vld [vmem:[%s4694_s1 + $0x54] sm:$0xf0]  ;;  %v2422_v9 = vld [vmem:[%s4694_s1 + $0x40] sm:$0xf]  ;;  %v2957_v10 = vld [vmem:[%s4694_s1 + $0x44] sm:$0xf0] }
   0xf   :  { %3070 = vmatpush.bf16.msra.mxu1 %v2447_v3  ;;  %3071 = vmatpush.bf16.msra.mxu2 %v2447_v3  ;;  %v2431_v8 = vor.u32 %v2959_v7, %v2430_v6  ;;  %v2423_v11 = vor.u32 %v2957_v10, %v2422_v9  ;;  %v2414_v12 = vld [vmem:[%s4694_s1 + $0x30] sm:$0xf]  ;;  %v2955_v13 = vld [vmem:[%s4694_s1 + $0x34] sm:$0xf0]  ;;  %v2406_v15 = vld [vmem:[%s4694_s1 + $0x20] sm:$0xf] }
  0x10   :  { %3072 = vmatpush.bf16.msra.mxu3 %v2447_v3  ;;  %1023 = vmatpush.bf16.msra.mxu0 %v2447_v3  ;;  %v2415_v14 = vor.u32 %v2955_v13, %v2414_v12  ;;  %v2953_v16 = vld [vmem:[%s4694_s1 + $0x24] sm:$0xf0]  ;;  %v2398_v18 = vld [vmem:[%s4694_s1 + $0x10] sm:$0xf]  ;;  %v2951_v19 = vld [vmem:[%s4694_s1 + $0x14] sm:$0xf0] }
  0x11   :  { %v2407_v17 = vor.u32 %v2953_v16, %v2406_v15  ;;  %v2399_v20 = vor.u32 %v2951_v19, %v2398_v18  ;;  %v2390_v21 = vld [vmem:[%s4694_s1] sm:$0xf]  ;;  %v2949_v22 = vld [vmem:[%s4694_s1 + $0x4] sm:$0xf0]  ;;  %v2222_v23 = vld [vmem:[%s4693_s0 + $0x70] sm:$0xf] }
  0x12   :  { %v2909_v24 = vld [vmem:[%s4693_s0 + $0x88] sm:$0xf0]  ;;  %v2510_v25 = vld [vmem:[%s4694_s1 + $0xf0] sm:$0xf]  ;;  %v2979_v26 = vld [vmem:[%s4694_s1 + $0xf4] sm:$0xf0]  ;;  %v2391_v31 = vor.u32 %v2949_v22, %v2390_v21 }
  0x13   :  { %3073 = vmatpush.bf16.msra.mxu1 %v2439_v5  ;;  %3074 = vmatpush.bf16.msra.mxu2 %v2439_v5  ;;  %v2574_v27 = vld [vmem:[%s4694_s1 + $0x170] sm:$0xf]  ;;  %v2995_v28 = vld [vmem:[%s4694_s1 + $0x174] sm:$0xf0]  ;;  %v2278_v32 = vld [vmem:[%s4693_s0 + $0xe0] sm:$0xf]  ;;  %v2511_v35 = vor.u32 %v2979_v26, %v2510_v25  ;;  %v3333_v44 = vor.u32 %v2909_v24, %v2222_v23 }
  0x14   :  { %3075 = vmatpush.bf16.msra.mxu3 %v2439_v5  ;;  %1024 = vmatpush.bf16.msra.mxu0 %v2439_v5  ;;  %v2638_v29 = vld [vmem:[%s4694_s1 + $0x1f0] sm:$0xf]  ;;  %v3011_v30 = vld [vmem:[%s4694_s1 + $0x1f4] sm:$0xf0]  ;;  %v2923_v33 = vld [vmem:[%s4693_s0 + $0xf8] sm:$0xf0]  ;;  %v2575_v39 = vor.u32 %v2995_v28, %v2574_v27 }
  0x15   :  { %v2334_v34 = vld [vmem:[%s4693_s0 + $0x150] sm:$0xf]  ;;  %v2937_v36 = vld [vmem:[%s4693_s0 + $0x168] sm:$0xf0]  ;;  %v2502_v37 = vld [vmem:[%s4694_s1 + $0xe0] sm:$0xf]  ;;  %v2639_v40 = vor.u32 %v3011_v30, %v2638_v29  ;;  %v3335_v45 = vor.u32 %v2923_v33, %v2278_v32 }
  0x16   :  { %v2977_v38 = vld [vmem:[%s4694_s1 + $0xe4] sm:$0xf0]  ;;  %v2566_v41 = vld [vmem:[%s4694_s1 + $0x160] sm:$0xf]  ;;  %v2702_v42 = vld [vmem:[%s4694_s1 + $0x270] sm:$0xf]  ;;  %v3346_v49 = vor.u32 %v2937_v36, %v2334_v34 }
  0x17   :  { %3076 = vmatpush.bf16.msra.mxu1 %v2431_v8  ;;  %3077 = vmatpush.bf16.msra.mxu2 %v2431_v8  ;;  %v3027_v43 = vld [vmem:[%s4694_s1 + $0x274] sm:$0xf0]  ;;  %v2993_v46 = vld [vmem:[%s4694_s1 + $0x164] sm:$0xf0]  ;;  %v2630_v47 = vld [vmem:[%s4694_s1 + $0x1e0] sm:$0xf]  ;;  %v2503_v53 = vor.u32 %v2977_v38, %v2502_v37 }
  0x18   :  { %3078 = vmatpush.bf16.msra.mxu3 %v2431_v8  ;;  %1025 = vmatpush.bf16.msra.mxu0 %v2431_v8  ;;  %v3009_v48 = vld [vmem:[%s4694_s1 + $0x1e4] sm:$0xf0]  ;;  %v2494_v50 = vld [vmem:[%s4694_s1 + $0xd0] sm:$0xf]  ;;  %v2166_v51 = vld [vmem:[%s4693_s0] sm:$0xf]  ;;  %v2703_v55 = vor.u32 %v3027_v43, %v2702_v42  ;;  %v2567_v56 = vor.u32 %v2993_v46, %v2566_v41 }
  0x19   :  { %v2895_v52 = vld [vmem:[%s4693_s0 + $0x18] sm:$0xf0]  ;;  %v2975_v54 = vld [vmem:[%s4694_s1 + $0xd4] sm:$0xf0]  ;;  %v2631_v57 = vor.u32 %v3009_v48, %v2630_v47  ;;  %v2558_v58 = vld [vmem:[%s4694_s1 + $0x150] sm:$0xf] }
  0x1a   :  { %v2694_v59 = vld [vmem:[%s4694_s1 + $0x260] sm:$0xf]  ;;  %v3025_v60 = vld [vmem:[%s4694_s1 + $0x264] sm:$0xf0]  ;;  %v2991_v61 = vld [vmem:[%s4694_s1 + $0x154] sm:$0xf0]  ;;  %v3374_v62 = vor.u32 %v2895_v52, %v2166_v51  ;;  %v2495_v1 = vor.u32 %v2975_v54, %v2494_v50 }
  0x1b   :  { %3079 = vmatpush.bf16.msra.mxu1 %v2423_v11  ;;  %3080 = vmatpush.bf16.msra.mxu2 %v2423_v11  ;;  %v2622_v63 = vld [vmem:[%s4694_s1 + $0x1d0] sm:$0xf]  ;;  %v3007_v0 = vld [vmem:[%s4694_s1 + $0x1d4] sm:$0xf0]  ;;  %v2486_v2 = vld [vmem:[%s4694_s1 + $0xc0] sm:$0xf]  ;;  %v2695_v4 = vor.u32 %v3025_v60, %v2694_v59  ;;  %v2559_v5 = vor.u32 %v2991_v61, %v2558_v58 }
  0x1c   :  { %3081 = vmatpush.bf16.msra.mxu3 %v2423_v11  ;;  %1026 = vmatpush.bf16.msra.mxu0 %v2423_v11  ;;  %v2973_v3 = vld [vmem:[%s4694_s1 + $0xc4] sm:$0xf0]  ;;  %v2623_v6 = vor.u32 %v3007_v0, %v2622_v63  ;;  %v2550_v7 = vld [vmem:[%s4694_s1 + $0x140] sm:$0xf]  ;;  %v2686_v8 = vld [vmem:[%s4694_s1 + $0x250] sm:$0xf] }
  0x1d   :  { %v3023_v9 = vld [vmem:[%s4694_s1 + $0x254] sm:$0xf0]  ;;  %v2989_v10 = vld [vmem:[%s4694_s1 + $0x144] sm:$0xf0]  ;;  %v2614_v11 = vld [vmem:[%s4694_s1 + $0x1c0] sm:$0xf]  ;;  %v2487_v13 = vor.u32 %v2973_v3, %v2486_v2 }
  0x1e   :  { %v3005_v12 = vld [vmem:[%s4694_s1 + $0x1c4] sm:$0xf0]  ;;  %v2971_v15 = vld [vmem:[%s4694_s1 + $0xb4] sm:$0xf0]  ;;  %v2687_v16 = vor.u32 %v3023_v9, %v2686_v8  ;;  %v2542_v21 = vld [vmem:[%s4694_s1 + $0x130] sm:$0xf] }
  0x1f   :  { %3082 = vmatpush.bf16.msra.mxu1 %v2415_v14  ;;  %3083 = vmatpush.bf16.msra.mxu2 %v2415_v14  ;;  %v2615_v18 = vor.u32 %v3005_v12, %v2614_v11  ;;  %v2250_v19 = vld [vmem:[%s4693_s0 + $0xa8] sm:$0xf]  ;;  %v2678_v22 = vld [vmem:[%s4694_s1 + $0x240] sm:$0xf]  ;;  %v2987_v24 = vld [vmem:[%s4694_s1 + $0x134] sm:$0xf0] }
  0x20   :  { %3084 = vmatpush.bf16.msra.mxu3 %v2415_v14  ;;  %1027 = vmatpush.bf16.msra.mxu0 %v2415_v14  ;;  %v2478_v14 = vld [vmem:[%s4694_s1 + $0xb0] sm:$0xf]  ;;  %v3021_v23 = vld [vmem:[%s4694_s1 + $0x244] sm:$0xf0]  ;;  %v3003_v26 = vld [vmem:[%s4694_s1 + $0x1b4] sm:$0xf0] }
  0x21   :  { %v2606_v25 = vld [vmem:[%s4694_s1 + $0x1b0] sm:$0xf]  ;;  %v2306_v27 = vld [vmem:[%s4693_s0 + $0x118] sm:$0xf]  ;;  %v2930_v28 = vld [vmem:[%s4693_s0 + $0x130] sm:$0xf0]  ;;  %v2479_v30 = vor.u32 %v2971_v15, %v2478_v14  ;;  %v2679_v34 = vor.u32 %v3021_v23, %v2678_v22 }
  0x22   :  { %v2362_v29 = vld [vmem:[%s4693_s0 + $0x188] sm:$0xf]  ;;  %v2470_v32 = vld [vmem:[%s4694_s1 + $0xa0] sm:$0xf]  ;;  %v2607_v36 = vor.u32 %v3003_v26, %v2606_v25  ;;  %v2670_v38 = vld [vmem:[%s4694_s1 + $0x230] sm:$0xf]  ;;  %v3467_v41 = vor.u32 %v2930_v28, %v2306_v27 }
  0x23   :  { %3085 = vmatpush.bf16.msra.mxu1 %v2407_v17  ;;  %3086 = vmatpush.bf16.msra.mxu2 %v2407_v17  ;;  %v2969_v33 = vld [vmem:[%s4694_s1 + $0xa4] sm:$0xf0]  ;;  %v2534_v37 = vld [vmem:[%s4694_s1 + $0x120] sm:$0xf]  ;;  %v2194_v48 = vld [vmem:[%s4693_s0 + $0x38] sm:$0xf] }
  0x24   :  { %3087 = vmatpush.bf16.msra.mxu3 %v2407_v17  ;;  %1028 = vmatpush.bf16.msra.mxu0 %v2407_v17  ;;  %v2551_v17 = vor.u32 %v2989_v10, %v2550_v7  ;;  %v2985_v42 = vld [vmem:[%s4694_s1 + $0x124] sm:$0xf0]  ;;  %v2598_v43 = vld [vmem:[%s4694_s1 + $0x1a0] sm:$0xf]  ;;  %v2902_v50 = vld [vmem:[%s4693_s0 + $0x50] sm:$0xf0]  ;;  %v2471_v51 = vor.u32 %v2969_v33, %v2470_v32 }
  0x25   :  { %v3001_v46 = vld [vmem:[%s4694_s1 + $0x1a4] sm:$0xf0]  ;;  %v2462_v52 = vld [vmem:[%s4694_s1 + $0x90] sm:$0xf]  ;;  %v2662_v58 = vld [vmem:[%s4694_s1 + $0x220] sm:$0xf]  ;;  %v3506_v61 = vor.u32 %v2902_v50, %v2194_v48 }
  0x26   :  { %v3017_v59 = vld [vmem:[%s4694_s1 + $0x224] sm:$0xf0]  ;;  %v2983_v60 = vld [vmem:[%s4694_s1 + $0x114] sm:$0xf0]  ;;  %v2590_v63 = vld [vmem:[%s4694_s1 + $0x190] sm:$0xf] }
  0x27   :  { %3088 = vmatpush.bf16.msra.mxu1 %v2399_v20  ;;  %3089 = vmatpush.bf16.msra.mxu2 %v2399_v20  ;;  %v2999_v0 = vld [vmem:[%s4694_s1 + $0x194] sm:$0xf0]  ;;  %v2454_v2 = vld [vmem:[%s4694_s1 + $0x80] sm:$0xf]  ;;  %v2965_v3 = vld [vmem:[%s4694_s1 + $0x84] sm:$0xf0] }
  0x28   :  { %3090 = vmatpush.bf16.msra.mxu3 %v2399_v20  ;;  %1029 = vmatpush.bf16.msra.mxu0 %v2399_v20  ;;  %v2916_v20 = vld [vmem:[%s4693_s0 + $0xc0] sm:$0xf0]  ;;  %v2518_v7 = vld [vmem:[%s4694_s1 + $0x100] sm:$0xf]  ;;  %v2654_v8 = vld [vmem:[%s4694_s1 + $0x210] sm:$0xf]  ;;  %v2455_v15 = vor.u32 %v2965_v3, %v2454_v2 }
  0x29   :  { %v3015_v9 = vld [vmem:[%s4694_s1 + $0x214] sm:$0xf0]  ;;  %v2981_v10 = vld [vmem:[%s4694_s1 + $0x104] sm:$0xf0]  ;;  %v2582_v11 = vld [vmem:[%s4694_s1 + $0x180] sm:$0xf] }
  0x2a   :  { %v2997_v12 = vld [vmem:[%s4694_s1 + $0x184] sm:$0xf0]  ;;  %v3043_v14 = vld [vmem:[%s4694_s1 + $0x2f4] sm:$0xf0]  ;;  %v2168_v22 = vld [vmem:[%s4693_s0 + $0x1c] sm:$0xf0] }
  0x2b   :  { %3091 = vmatpush.bf16.msra.mxu1 %v2391_v31  ;;  %3092 = vmatpush.bf16.msra.mxu2 %v2391_v31  ;;  %v2896_v25 = vld [vmem:[%s4693_s0 + $0x20] sm:$0xf0]  ;;  %v2893_v26 = vld [vmem:[%s4693_s0 + $0xc] sm:$0xf]  ;;  %v2176_v27 = vld [vmem:[%s4693_s0 + $0x24] sm:$0xf0] }
  0x2c   :  { %3093 = vmatpush.bf16.msra.mxu3 %v2391_v31  ;;  %1030 = vmatpush.bf16.msra.mxu0 %v2391_v31  ;;  %v2944_v31 = vld [vmem:[%s4693_s0 + $0x1a0] sm:$0xf0]  ;;  %v3580_v33 = vor.u32 %v2893_v26, %v2176_v27  ;;  %v2202_v48 = vld [vmem:[%s4693_s0 + $0x40] sm:$0xf]  ;;  %v2903_v50 = vld [vmem:[%s4693_s0 + $0x58] sm:$0xf0] }
  0x2d   :  { %v3478_v47 = vor.u32 %v2944_v31, %v2362_v29  ;;  %v2758_v29 = vld [vmem:[%s4694_s1 + $0x2e0] sm:$0xf]  ;;  %v2230_v2 = vld [vmem:[%s4693_s0 + $0x78] sm:$0xf]  ;;  %v2910_v3 = vld [vmem:[%s4693_s0 + $0x90] sm:$0xf0] }
  0x2e   :  { %1041 = vmatmul.bf16.vlgmr.msra.gmra.mxu1 %v3333_v44  ;;  %1051 = vmatmul.bf16.vlgmr.msra.gmra.mxu2 %v3335_v45  ;;  %v2726_v27 = vld [vmem:[%s4694_s1 + $0x2a0] sm:$0xf]  ;;  %vm998_vm0 = vcmask 130048   ;;  %s2150_s24 = sshll.u32 %s4700_s7, 4  ;;  %s3186_s25 = smov 128   ;;  %s2151_s24 = int_to_ptr.hbm [resolvable:$true] %s2150_s24 }
  0x2f   :  { %1072 = vmatpush.bf16.msrb.mxu1 %v2511_v35  ;;  %1121 = vmatpush.bf16.msrb.mxu2 %v2575_v39  ;;  %v2543_v35 = vor.u32 %v2987_v24, %v2542_v21  ;;  %v3019_v39 = vld [vmem:[%s4694_s1 + $0x234] sm:$0xf0]  ;;  %v2892_v21 = vld [vmem:[%s4693_s0 + $0x4] sm:$0xf]  ;;  %v2174_v24 = vld [vmem:[%s4693_s0 + $0x8] sm:$0xf] }
  0x30   :  { %1170 = vmatpush.bf16.msrb.mxu3 %v2639_v40  ;;  %1219 = vmatpush.bf16.msrb.mxu0 %v2703_v55  ;;  %v3465_v40 = vor.u32 %v2916_v20, %v2250_v19  ;;  %v2671_v54 = vor.u32 %v3019_v39, %v2670_v38  ;;  %v2535_v55 = vor.u32 %v2985_v42, %v2534_v37  ;;  %v2646_v19 = vld [vmem:[%s4694_s1 + $0x200] sm:$0xf]  ;;  %v3013_v20 = vld [vmem:[%s4694_s1 + $0x204] sm:$0xf0]  ;;  %v2750_v38 = vld [vmem:[%s4694_s1 + $0x2d0] sm:$0xf] }
  0x31   :  { %1061 = vmatmul.bf16.vlgmr.msra.gmra.mxu3 %v3346_v49  ;;  %1031 = vmatmul.bf16.vlgmr.msra.gmra.mxu0 %v3374_v62  ;;  %v2647_v28 = vor.u32 %v3013_v20, %v2646_v19  ;;  %v3576_v31 = vor.u32 %v2892_v21, %v2168_v22  ;;  %v3578_v32 = vor.u32 %v2896_v25, %v2174_v24  ;;  %v3039_v39 = vld [vmem:[%s4694_s1 + $0x2d4] sm:$0xf0]  ;;  %v2914_v19 = vld [vmem:[%s4693_s0 + $0xb4] sm:$0xf]  ;;  %v2260_v20 = vld [vmem:[%s4693_s0 + $0xcc] sm:$0xf0] }
  0x32   :  { %v2751_v42 = vor.u32 %v3039_v39, %v2750_v38  ;;  %v2266_v24 = vld [vmem:[%s4693_s0 + $0xb8] sm:$0xf]  ;;  %v2918_v25 = vld [vmem:[%s4693_s0 + $0xd0] sm:$0xf0]  ;;  %v2921_v38 = vld [vmem:[%s4693_s0 + $0xec] sm:$0xf] }
  0x33   :  { %1073 = vmatpush.bf16.msrb.mxu1 %v2503_v53  ;;  %1122 = vmatpush.bf16.msrb.mxu2 %v2567_v56  ;;  %v2967_v53 = vld [vmem:[%s4694_s1 + $0x94] sm:$0xf0]  ;;  %v2599_v56 = vor.u32 %v3001_v46, %v2598_v43  ;;  %v2899_v43 = vld [vmem:[%s4693_s0 + $0x3c] sm:$0xf]  ;;  %v3716_v26 = vor.u32 %v2918_v25, %v2266_v24  ;;  %v2288_v39 = vld [vmem:[%s4693_s0 + $0x104] sm:$0xf0] }
  0x34   :  { %1171 = vmatpush.bf16.msrb.mxu3 %v2631_v57  ;;  %1220 = vmatpush.bf16.msrb.mxu0 %v2695_v4  ;;  %v2526_v57 = vld [vmem:[%s4694_s1 + $0x110] sm:$0xf]  ;;  %v2663_v4 = vor.u32 %v3017_v59, %v2662_v58  ;;  %v2196_v46 = vld [vmem:[%s4693_s0 + $0x54] sm:$0xf0]  ;;  %v2742_v59 = vld [vmem:[%s4694_s1 + $0x2c0] sm:$0xf] }
  0x35   :  { %v2956_v24 = vld [vmem:[%s4694_s1 + $0x44] sm:$0xf]  ;;  %v2424_v25 = vld [vmem:[%s4694_s1 + $0x48] sm:$0xf0]  ;;  %s3187_s26 = smov 8  }
  0x37   :  { %1074 = vmatpush.bf16.msrb.mxu1 %v2495_v1  ;;  %1123 = vmatpush.bf16.msrb.mxu2 %v2559_v5  ;;  %v2463_v1 = vor.u32 %v2967_v53, %v2462_v52  ;;  %v2527_v5 = vor.u32 %v2983_v60, %v2526_v57  ;;  %v2204_v52 = vld [vmem:[%s4693_s0 + $0x5c] sm:$0xf0]  ;;  %v3618_v53 = vor.u32 %v2899_v43, %v2196_v46  ;;  %v2904_v57 = vld [vmem:[%s4693_s0 + $0x60] sm:$0xf0]  ;;  %v3037_v60 = vld [vmem:[%s4694_s1 + $0x2c4] sm:$0xf0] }
  0x38   :  { %1172 = vmatpush.bf16.msrb.mxu3 %v2623_v6  ;;  %1221 = vmatpush.bf16.msrb.mxu0 %v2687_v16  ;;  %v2591_v6 = vor.u32 %v2999_v0, %v2590_v63  ;;  %v2655_v16 = vor.u32 %v3015_v9, %v2654_v8  ;;  %v2743_v63 = vor.u32 %v3037_v60, %v2742_v59  ;;  %v2906_v0 = vld [vmem:[%s4693_s0 + $0x74] sm:$0xf]  ;;  %v2238_v9 = vld [vmem:[%s4693_s0 + $0x80] sm:$0xf]  ;;  %v2448_v60 = vld [vmem:[%s4694_s1 + $0x78] sm:$0xf0] }
  0x39   :  { %v3748_v46 = vor.u32 %v2921_v38, %v2288_v39  ;;  %v2710_v39 = vld [vmem:[%s4694_s1 + $0x280] sm:$0xf] }
  0x3b   :  { %1075 = vmatpush.bf16.msrb.mxu1 %v2487_v13  ;;  %1124 = vmatpush.bf16.msrb.mxu2 %v2551_v17  ;;  %v2766_v13 = vld [vmem:[%s4694_s1 + $0x2f0] sm:$0xf]  ;;  %v2519_v17 = vor.u32 %v2981_v10, %v2518_v7  ;;  %v3662_v7 = vor.u32 %v2910_v3, %v2230_v2  ;;  %v2911_v10 = vld [vmem:[%s4693_s0 + $0x98] sm:$0xf0] }
  0x3c   :  { %1173 = vmatpush.bf16.msrb.mxu3 %v2615_v18  ;;  %1222 = vmatpush.bf16.msrb.mxu0 %v2679_v34  ;;  %v2583_v18 = vor.u32 %v2997_v12, %v2582_v11  ;;  %v2767_v23 = vor.u32 %v3043_v14, %v2766_v13  ;;  %v2182_v34 = vld [vmem:[%s4693_s0 + $0x10] sm:$0xf]  ;;  %v3674_v11 = vor.u32 %v2911_v10, %v2238_v9  ;;  %v3035_v13 = vld [vmem:[%s4694_s1 + $0x2b4] sm:$0xf0]  ;;  %v2927_v3 = vld [vmem:[%s4693_s0 + $0x11c] sm:$0xf] }
  0x3d   :  { %v2734_v12 = vld [vmem:[%s4694_s1 + $0x2b0] sm:$0xf]  ;;  %v2432_v9 = vld [vmem:[%s4694_s1 + $0x58] sm:$0xf0]  ;;  %v2978_v10 = vld [vmem:[%s4694_s1 + $0xf4] sm:$0xf] }
  0x3e   :  { %1046 = vmatmul.bf16.gmra.mxu1 %v3465_v40  ;;  %1056 = vmatmul.bf16.gmra.mxu2 %v3467_v41  ;;  %v2735_v14 = vor.u32 %v3035_v13, %v2734_v12  ;;  %v2314_v12 = vld [vmem:[%s4693_s0 + $0x120] sm:$0xf]  ;;  %v2931_v13 = vld [vmem:[%s4693_s0 + $0x138] sm:$0xf0] }
  0x3f   :  { %1076 = vmatpush.bf16.msrb.mxu1 %v2479_v30  ;;  %1125 = vmatpush.bf16.msrb.mxu2 %v2543_v35  ;;  %v3041_v30 = vld [vmem:[%s4694_s1 + $0x2e4] sm:$0xf0]  ;;  %v2897_v35 = vld [vmem:[%s4693_s0 + $0x28] sm:$0xf0] }
  0x40   :  { %1174 = vmatpush.bf16.msrb.mxu3 %v2607_v36  ;;  %1223 = vmatpush.bf16.msrb.mxu0 %v2671_v54  ;;  %v2759_v36 = vor.u32 %v3041_v30, %v2758_v29  ;;  %v3590_v37 = vor.u32 %v2897_v35, %v2182_v34  ;;  %v3620_v54 = vor.u32 %v2903_v50, %v2202_v48  ;;  %v2920_v30 = vld [vmem:[%s4693_s0 + $0xe4] sm:$0xf]  ;;  %v2280_v34 = vld [vmem:[%s4693_s0 + $0xfc] sm:$0xf0]  ;;  %v2286_v35 = vld [vmem:[%s4693_s0 + $0xe8] sm:$0xf] }
  0x41   :  { %1066 = vmatmul.bf16.gmra.mxu3 %v3478_v47  ;;  %1036 = vmatmul.bf16.gmra.mxu0 %v3506_v61  ;;  %v2294_v48 = vld [vmem:[%s4693_s0 + $0xf0] sm:$0xf]  ;;  %v2925_v50 = vld [vmem:[%s4693_s0 + $0x108] sm:$0xf0] }
  0x43   :  { %1077 = vmatpush.bf16.msrb.mxu1 %v2471_v51  ;;  %1126 = vmatpush.bf16.msrb.mxu2 %v2535_v55  ;;  %v2900_v51 = vld [vmem:[%s4693_s0 + $0x44] sm:$0xf] }
  0x44   :  { %1175 = vmatpush.bf16.msrb.mxu3 %v2599_v56  ;;  %1224 = vmatpush.bf16.msrb.mxu0 %v2663_v4  ;;  %v3622_v55 = vor.u32 %v2900_v51, %v2204_v52  ;;  %v2210_v56 = vld [vmem:[%s4693_s0 + $0x48] sm:$0xf]  ;;  %v2907_v4 = vld [vmem:[%s4693_s0 + $0x7c] sm:$0xf]  ;;  %v3758_v51 = vor.u32 %v2925_v50, %v2294_v48  ;;  %v2718_v52 = vld [vmem:[%s4694_s1 + $0x290] sm:$0xf] }
  0x45   :  { %v3632_v58 = vor.u32 %v2904_v57, %v2210_v56  ;;  %v3031_v56 = vld [vmem:[%s4694_s1 + $0x294] sm:$0xf0]  ;;  %v2962_v57 = vld [vmem:[%s4694_s1 + $0x74] sm:$0xf]  ;;  %v3029_v48 = vld [vmem:[%s4694_s1 + $0x284] sm:$0xf0] }
  0x46   :  { %v2719_v59 = vor.u32 %v3031_v56, %v2718_v52  ;;  %v2954_v50 = vld [vmem:[%s4694_s1 + $0x34] sm:$0xf]  ;;  %v2711_v52 = vor.u32 %v3029_v48, %v2710_v39  ;;  %v2416_v56 = vld [vmem:[%s4694_s1 + $0x38] sm:$0xf0]  ;;  %v2948_v39 = vld [vmem:[%s4694_s1 + $0x4] sm:$0xf] }
  0x47   :  { %1078 = vmatpush.bf16.msrb.mxu1 %v2463_v1  ;;  %1127 = vmatpush.bf16.msrb.mxu2 %v2527_v5  ;;  %v2224_v1 = vld [vmem:[%s4693_s0 + $0x8c] sm:$0xf0]  ;;  %v2232_v5 = vld [vmem:[%s4693_s0 + $0x94] sm:$0xf0]  ;;  %v2392_v48 = vld [vmem:[%s4694_s1 + $0x8] sm:$0xf0] }
  0x48   :  { %1176 = vmatpush.bf16.msrb.mxu3 %v2591_v6  ;;  %1225 = vmatpush.bf16.msrb.mxu0 %v2655_v16  ;;  %v3660_v6 = vor.u32 %v2906_v0, %v2224_v1  ;;  %v3664_v8 = vor.u32 %v2907_v4, %v2232_v5  ;;  %v2252_v16 = vld [vmem:[%s4693_s0 + $0xc4] sm:$0xf0]  ;;  %v2960_v0 = vld [vmem:[%s4694_s1 + $0x64] sm:$0xf]  ;;  %v2440_v1 = vld [vmem:[%s4694_s1 + $0x68] sm:$0xf0] }
  0x49   :  { %v2443_v2 = vor.u32 %v2960_v0, %v2440_v1  ;;  %v2308_v4 = vld [vmem:[%s4693_s0 + $0x134] sm:$0xf0]  ;;  %v2958_v5 = vld [vmem:[%s4694_s1 + $0x54] sm:$0xf]  ;;  %v2774_v0 = vld [vmem:[%s4694_s1 + $0x300] sm:$0xf] }
  0x4a   :  { %v3045_v1 = vld [vmem:[%s4694_s1 + $0x304] sm:$0xf0] }
  0x4b   :  { %1079 = vmatpush.bf16.msrb.mxu1 %v2455_v15  ;;  %1128 = vmatpush.bf16.msrb.mxu2 %v2519_v17  ;;  %v2913_v15 = vld [vmem:[%s4693_s0 + $0xac] sm:$0xf]  ;;  %v2258_v17 = vld [vmem:[%s4693_s0 + $0xb0] sm:$0xf] }
  0x4c   :  { %1177 = vmatpush.bf16.msrb.mxu3 %v2583_v18  ;;  %1226 = vmatpush.bf16.msrb.mxu0 %v2647_v28  ;;  %v2917_v18 = vld [vmem:[%s4693_s0 + $0xc8] sm:$0xf0]  ;;  %v3702_v21 = vor.u32 %v2913_v15, %v2252_v16  ;;  %v3033_v28 = vld [vmem:[%s4694_s1 + $0x2a4] sm:$0xf0]  ;;  %v2512_v15 = vld [vmem:[%s4694_s1 + $0xf8] sm:$0xf0] }
  0x4d   :  { %v3704_v22 = vor.u32 %v2917_v18, %v2258_v17  ;;  %v2727_v29 = vor.u32 %v3033_v28, %v2726_v27  ;;  %v2928_v16 = vld [vmem:[%s4693_s0 + $0x124] sm:$0xf]  ;;  %v2316_v17 = vld [vmem:[%s4693_s0 + $0x13c] sm:$0xf0]  ;;  %v2515_v18 = vor.u32 %v2978_v10, %v2512_v15  ;;  %v2950_v15 = vld [vmem:[%s4694_s1 + $0x14] sm:$0xf] }
  0x4e   :  { %1080 = vmatmul.bf16.vlgmr.msrb.gmra.mxu1 %v3576_v31  ;;  %1129 = vmatmul.bf16.vlgmr.msrb.gmra.mxu2 %v3578_v32  ;;  %v2976_v27 = vld [vmem:[%s4694_s1 + $0xe4] sm:$0xf]  ;;  %v3823_v28 = vor.u32 %v2928_v16, %v2316_v17  ;;  %v2400_v16 = vld [vmem:[%s4694_s1 + $0x18] sm:$0xf0]  ;;  %v2970_v17 = vld [vmem:[%s4694_s1 + $0xb4] sm:$0xf] }
  0x4f   :  { %1268 = vmatpush.bf16.msra.mxu1 %v2767_v23  ;;  %v3706_v23 = vor.u32 %v2914_v19, %v2260_v20  ;;  %v3810_v19 = vor.u32 %v2927_v3, %v2308_v4  ;;  %v3812_v20 = vor.u32 %v2931_v13, %v2314_v12  ;;  %v2775_v3 = vor.u32 %v3045_v1, %v2774_v0  ;;  %v2408_v4 = vld [vmem:[%s4694_s1 + $0x28] sm:$0xf0]  ;;  %v2934_v13 = vld [vmem:[%s4693_s0 + $0x154] sm:$0xf]  ;;  %v3935_v1 = vld [vmem:[%s4695_s2] sm:$0x3] }
  0x50   :  { %1415 = vmatpush.bf16.msra.mxu0 %v2515_v18  ;;  %4715 = vst [vmem:[#allocation11_spill] sm:$0xff] %v3823_v28  ;;  %v2342_v18 = vld [vmem:[%s4693_s0 + $0x158] sm:$0xf] }
  0x51   :  { %1178 = vmatmul.bf16.vlgmr.msrb.gmra.mxu3 %v3580_v33  ;;  %1227 = vmatmul.bf16.vlgmr.msrb.gmra.mxu0 %v3590_v37 }
  0x52   :  { %1324 = vmatpush.bf16.msra.mxu2 %v2775_v3  ;;  %v2994_v3 = vld [vmem:[%s4694_s1 + $0x174] sm:$0xf] }
  0x53   :  { %1269 = vmatpush.bf16.msra.mxu1 %v2759_v36  ;;  %v2924_v36 = vld [vmem:[%s4693_s0 + $0x100] sm:$0xf0] }
  0x54   :  { %v3746_v43 = vor.u32 %v2924_v36, %v2286_v35  ;;  %v2427_v35 = vor.u32 %v2956_v24, %v2424_v25  ;;  %v2938_v24 = vld [vmem:[%s4693_s0 + $0x170] sm:$0xf0]  ;;  %v2480_v25 = vld [vmem:[%s4694_s1 + $0xb8] sm:$0xf0] }
  0x57   :  { %1270 = vmatpush.bf16.msra.mxu1 %v2751_v42  ;;  %v3744_v42 = vor.u32 %v2920_v30, %v2280_v34  ;;  %v2932_v30 = vld [vmem:[%s4693_s0 + $0x140] sm:$0xf0]  ;;  %v2504_v34 = vld [vmem:[%s4694_s1 + $0xe8] sm:$0xf0] }
  0x58   :  { %v2507_v36 = vor.u32 %v2976_v27, %v2504_v34  ;;  %v2935_v27 = vld [vmem:[%s4693_s0 + $0x15c] sm:$0xf]  ;;  %v2483_v34 = vor.u32 %v2970_v17, %v2480_v25 }
  0x5a   :  { %1416 = vmatpush.bf16.msra.mxu0 %v2507_v36  ;;  %v3908_v36 = vor.u32 %v2938_v24, %v2342_v18  ;;  %v2964_v18 = vld [vmem:[%s4694_s1 + $0x84] sm:$0xf]  ;;  %v2456_v24 = vld [vmem:[%s4694_s1 + $0x88] sm:$0xf0] }
  0x5b   :  { %1271 = vmatpush.bf16.msra.mxu1 %v2743_v63  ;;  %v2451_v63 = vor.u32 %v2962_v57, %v2448_v60  ;;  %v2974_v57 = vld [vmem:[%s4694_s1 + $0xd4] sm:$0xf]  ;;  %v2419_v60 = vor.u32 %v2954_v50, %v2416_v56  ;;  %v2968_v50 = vld [vmem:[%s4694_s1 + $0xa4] sm:$0xf] }
  0x5c   :  { %4717 = vst [vmem:[#allocation13_spill] sm:$0xff] %v3908_v36 }
  0x5d   :  { %1366 = vmatpush.bf16.msra.mxu3 %v2451_v63 }
  0x5e   :  { %1085 = vmatmul.bf16.gmra.mxu1 %v3618_v53  ;;  %1134 = vmatmul.bf16.gmra.mxu2 %v3620_v54 }
  0x5f   :  { %1272 = vmatpush.bf16.msra.mxu1 %v2735_v14  ;;  %v2435_v14 = vor.u32 %v2958_v5, %v2432_v9  ;;  %v2972_v5 = vld [vmem:[%s4694_s1 + $0xc4] sm:$0xf]  ;;  %v2488_v9 = vld [vmem:[%s4694_s1 + $0xc8] sm:$0xf0] }
  0x60   :  { %v2491_v12 = vor.u32 %v2972_v5, %v2488_v9  ;;  %v2966_v5 = vld [vmem:[%s4694_s1 + $0x94] sm:$0xf] }
  0x61   :  { %1183 = vmatmul.bf16.gmra.mxu3 %v3622_v55  ;;  %1232 = vmatmul.bf16.gmra.mxu0 %v3632_v58 }
  0x62   :  { %1367 = vmatpush.bf16.msra.mxu3 %v2443_v2  ;;  %v2952_v2 = vld [vmem:[%s4694_s1 + $0x24] sm:$0xf] }
  0x63   :  { %1273 = vmatpush.bf16.msra.mxu1 %v2727_v29  ;;  %v2322_v29 = vld [vmem:[%s4693_s0 + $0x128] sm:$0xf]  ;;  %v2411_v10 = vor.u32 %v2952_v2, %v2408_v4  ;;  %v2576_v4 = vld [vmem:[%s4694_s1 + $0x178] sm:$0xf0] }
  0x64   :  { %v3836_v38 = vor.u32 %v2932_v30, %v2322_v29  ;;  %v2344_v29 = vld [vmem:[%s4693_s0 + $0x174] sm:$0xf0]  ;;  %v2403_v30 = vor.u32 %v2950_v15, %v2400_v16 }
  0x65   :  { %v3921_v56 = vor.u32 %v2935_v27, %v2344_v29  ;;  %v2459_v29 = vor.u32 %v2964_v18, %v2456_v24  ;;  %v2992_v18 = vld [vmem:[%s4694_s1 + $0x164] sm:$0xf]  ;;  %v2568_v24 = vld [vmem:[%s4694_s1 + $0x168] sm:$0xf0] }
  0x66   :  { %1368 = vmatpush.bf16.msra.mxu3 %v2435_v14  ;;  %4716 = vst [vmem:[#allocation12_spill] sm:$0xff] %v3836_v38  ;;  %v2336_v14 = vld [vmem:[%s4693_s0 + $0x16c] sm:$0xf0] }
  0x67   :  { %1274 = vmatpush.bf16.msra.mxu1 %v2719_v59  ;;  %v2496_v59 = vld [vmem:[%s4694_s1 + $0xd8] sm:$0xf0]  ;;  %4718 = vst [vmem:[#allocation14_spill] sm:$0xff] %v3921_v56 }
  0x68   :  { %v2499_v63 = vor.u32 %v2974_v57, %v2496_v59  ;;  %v2350_v57 = vld [vmem:[%s4693_s0 + $0x160] sm:$0xf]  ;;  %v2939_v59 = vld [vmem:[%s4693_s0 + $0x178] sm:$0xf0] }
  0x69   :  { %v3939_v2 = vor.u32 %v2939_v59, %v2350_v57  ;;  %v2942_v57 = vld [vmem:[%s4693_s0 + $0x194] sm:$0xf]  ;;  %v2372_v59 = vld [vmem:[%s4693_s0 + $0x1ac] sm:$0xf0] }
  0x6a   :  { %1369 = vmatpush.bf16.msra.mxu3 %v2427_v35  ;;  %1417 = vmatpush.bf16.msra.mxu0 %v2499_v63  ;;  %v3906_v35 = vor.u32 %v2934_v13, %v2336_v14  ;;  %v2395_v63 = vor.u32 %v2948_v39, %v2392_v48  ;;  %v3955_v13 = vperm.slane %v3935_v1, 0  ;;  %v2364_v39 = vld [vmem:[%s4693_s0 + $0x1a4] sm:$0xf0]  ;;  %v2370_v48 = vld [vmem:[%s4693_s0 + $0x190] sm:$0xf] }
  0x6b   :  { %1275 = vmatpush.bf16.msra.mxu1 %v2711_v52  ;;  %4719 = vst [vmem:[#allocation15_spill] sm:$0xff] %v3939_v2 }
  0x6e   :  { %1090 = vmatmul.bf16.gmra.mxu1 %v3660_v6  ;;  %1139 = vmatmul.bf16.gmra.mxu2 %v3662_v7 }
  0x6f   :  { %1370 = vmatpush.bf16.msra.mxu3 %v2419_v60  ;;  %1418 = vmatpush.bf16.msra.mxu0 %v2491_v12  ;;  %v2472_v60 = vld [vmem:[%s4694_s1 + $0xa8] sm:$0xf0]  ;;  %v2464_v12 = vld [vmem:[%s4694_s1 + $0x98] sm:$0xf0] }
  0x70   :  { %v2475_v0 = vor.u32 %v2968_v50, %v2472_v60  ;;  %v2467_v14 = vor.u32 %v2966_v5, %v2464_v12  ;;  %v2945_v50 = vld [vmem:[%s4693_s0 + $0x1a8] sm:$0xf0]  ;;  %v4002_v12 = vor.u32 %v2942_v57, %v2372_v59 }
  0x71   :  { %1188 = vmatmul.bf16.gmra.mxu3 %v3664_v8  ;;  %1237 = vmatmul.bf16.gmra.mxu0 %v3674_v11 }
  0x72   :  { %4721 = vst [vmem:[#allocation17_spill] sm:$0xff] %v4002_v12 }
  0x73   :  { %1371 = vmatpush.bf16.msra.mxu3 %v2411_v10  ;;  %1419 = vmatpush.bf16.msra.mxu0 %v2483_v34  ;;  %v2579_v10 = vor.u32 %v2994_v3, %v2576_v4  ;;  %v3995_v4 = vor.u32 %v2945_v50, %v2370_v48 }
  0x75   :  { %1464 = vmatpush.bf16.msrb.mxu1 %v2579_v10  ;;  %4720 = vst [vmem:[#allocation16_spill] sm:$0xff] %v3995_v4 }
  0x77   :  { %1372 = vmatpush.bf16.msra.mxu3 %v2403_v30  ;;  %1420 = vmatpush.bf16.msra.mxu0 %v2475_v0  ;;  %v2941_v30 = vld [vmem:[%s4693_s0 + $0x18c] sm:$0xf] }
  0x78   :  { %v3993_v3 = vor.u32 %v2941_v30, %v2364_v39  ;;  %v2571_v30 = vor.u32 %v2992_v18, %v2568_v24  ;;  %v2898_v18 = vld [vmem:[%s4693_s0 + $0x30] sm:$0xf0] }
  0x7a   :  { %1465 = vmatpush.bf16.msrb.mxu1 %v2571_v30 }
  0x7b   :  { %1373 = vmatpush.bf16.msra.mxu3 %v2395_v63  ;;  %1421 = vmatpush.bf16.msra.mxu0 %v2467_v14  ;;  %v2378_v14 = vld [vmem:[%s4693_s0 + $0x198] sm:$0xf] }
  0x7e   :  { %1095 = vmatmul.bf16.gmra.mxu1 %v3702_v21  ;;  %1144 = vmatmul.bf16.gmra.mxu2 %v3704_v22 }
  0x7f   :  { %1422 = vmatpush.bf16.msra.mxu0 %v2459_v29 }
  0x81   :  { %1193 = vmatmul.bf16.gmra.mxu3 %v3706_v23  ;;  %1242 = vmatmul.bf16.gmra.mxu0 %v3716_v26 }
  0x8e   :  { %1100 = vmatmul.bf16.gmra.mxu1 %v3744_v42  ;;  %1149 = vmatmul.bf16.gmra.mxu2 %v3746_v43 }
  0x91   :  { %1198 = vmatmul.bf16.gmra.mxu3 %v3748_v46  ;;  %1247 = vmatmul.bf16.gmra.mxu0 %v3758_v51 }
  0x9e   :  { %1105 = vmatmul.bf16.gmra.mxu1 %v3810_v19  ;;  %1154 = vmatmul.bf16.gmra.mxu2 %v3812_v20 }
  0xa1   :  { %1203 = vmatmul.bf16.gmra.mxu3 %v3823_v28  ;;  %1252 = vmatmul.bf16.gmra.mxu0 %v3836_v38  ;;  %v2901_v28 = vld [vmem:[%s4693_s0 + $0x4c] sm:$0xf] }
  0xab   :  { %v3919_v52 = vpop.f32.mrf.mxu1 }
  0xae   :  { %1110 = vmatmul.bf16.gmra.mxu1 %v3906_v35  ;;  %1159 = vmatmul.bf16.gmra.mxu2 %v3908_v36  ;;  %v1032_v9 = vpop.f32.mrf.mxu0 }
  0xaf   :  { %v1033_v24 = vadd.f32 %v1032_v9, %v3955_v13  ;;  %v2990_v9 = vld [vmem:[%s4694_s1 + $0x154] sm:$0xf] }
  0xb1   :  { %1208 = vmatmul.bf16.gmra.mxu3 %v3921_v56  ;;  %v1052_v15 = vpop.f32.mrf.mxu2  ;;  %1257 = vmatmul.bf16.gmra.mxu0 %v3939_v2 }
  0xb2   :  { %v3958_v16 = vadd.f32 %v1052_v15, %v3955_v13  ;;  %v2946_v15 = vld [vmem:[%s4693_s0 + $0x1b0] sm:$0xf0] }
  0xb3   :  { %v3967_v25 = vpop.f32.mrf.mxu1 }
  0xb4   :  { %v1062_v17 = vpop.f32.mrf.mxu3 }
  0xb5   :  { %v3970_v27 = vadd.f32 %v1062_v17, %v3955_v13  ;;  %v4012_v17 = vor.u32 %v2946_v15, %v2378_v14  ;;  %v2184_v14 = vld [vmem:[%s4693_s0 + $0x2c] sm:$0xf0]  ;;  %v2190_v15 = vld [vmem:[%s4693_s0 + $0x18] sm:$0xf] }
  0xb6   :  { %v1034_v34 = vpop.f32.mrf.mxu0 }
  0xb7   :  { %4722 = vst [vmem:[#allocation18_spill] sm:$0xff] %v4012_v17 }
  0xb9   :  { %v1054_v60 = vpop.f32.mrf.mxu2 }
  0xba   :  { %v3991_v63 = vadd.f32 %v1054_v60, %v3955_v13  ;;  %v2894_v60 = vld [vmem:[%s4693_s0 + $0x14] sm:$0xf] }
  0xbb   :  { %v3997_v5 = vpop.f32.mrf.mxu1 }
  0xbc   :  { %v1064_v0 = vpop.f32.mrf.mxu3 }
  0xbd   :  { %v4000_v10 = vadd.f32 %v1064_v0, %v3955_v13 }
  0xbe   :  { %1115 = vmatmul.bf16.gmra.mxu1 %v3993_v3  ;;  %1164 = vmatmul.bf16.gmra.mxu2 %v3995_v4  ;;  %v1037_v29 = vpop.f32.mrf.mxu0 }
  0xc1   :  { %1213 = vmatmul.bf16.gmra.mxu3 %v4002_v12  ;;  %v1057_v39 = vpop.f32.mrf.mxu2  ;;  %1262 = vmatmul.bf16.gmra.mxu0 %v4012_v17  ;;  %v4046_v17 = vor.u32 %v2894_v60, %v2184_v14  ;;  %v4048_v12 = vor.u32 %v2898_v18, %v2190_v15  ;;  %v2560_v60 = vld [vmem:[%s4694_s1 + $0x158] sm:$0xf0]  ;;  %v1035_v18 = vadd.f32 %v1034_v34, %v3955_v13  ;;  %v2212_v34 = vld [vmem:[%s4693_s0 + $0x64] sm:$0xf0] }
  0xc2   :  { %v4022_v48 = vadd.f32 %v1057_v39, %v3955_v13  ;;  %v2563_v15 = vor.u32 %v2990_v9, %v2560_v60 }
  0xc3   :  { %v4025_v57 = vpop.f32.mrf.mxu1  ;;  %4723 = vst [vmem:[#allocation19_spill] sm:$0xff] %v4048_v12 }
  0xc4   :  { %v1067_v50 = vpop.f32.mrf.mxu3  ;;  %1466 = vmatpush.bf16.msrb.mxu1 %v2563_v15  ;;  %v4080_v15 = vor.u32 %v2901_v28, %v2212_v34  ;;  %v2552_v28 = vld [vmem:[%s4694_s1 + $0x148] sm:$0xf0] }
  0xc5   :  { %v4028_v59 = vadd.f32 %v1067_v50, %v3955_v13 }
  0xc6   :  { %v1039_v0 = vpop.f32.mrf.mxu0 }
  0xc9   :  { %v1059_v30 = vpop.f32.mrf.mxu2 }
  0xca   :  { %v4044_v39 = vadd.f32 %v1059_v30, %v3955_v13 }
  0xcb   :  { %v1081_v2 = vpop.f32.mrf.mxu1 }
  0xcc   :  { %v1069_v50 = vpop.f32.mrf.mxu3  ;;  %v1082_v56 = vadd.f32 %v1081_v2, %v1033_v24 }
  0xcd   :  { %v4051_v4 = vadd.f32 %v1069_v50, %v3955_v13 }
  0xce   :  { %1276 = vmatmul.bf16.vlgmr.msra.gmra.mxu1 %v4046_v17  ;;  %2780 = vmatmul.msk.bf16.vlgmr.msra.gmra.mxu2 %vm998_vm0, %v4048_v12  ;;  %v1228_v14 = vpop.f32.mrf.mxu0 }
  0xd1   :  { %1374 = vmatmul.bf16.vlgmr.msra.gmra.mxu3 %v3374_v62  ;;  %v1130_v2 = vpop.f32.mrf.mxu2  ;;  %1423 = vmatmul.bf16.vlgmr.msra.gmra.mxu0 %v3576_v31  ;;  %v2905_v31 = vld [vmem:[%s4693_s0 + $0x68] sm:$0xf0] }
  0xd2   :  { %v1131_v24 = vadd.f32 %v1130_v2, %v1082_v56  ;;  %v2218_v56 = vld [vmem:[%s4693_s0 + $0x50] sm:$0xf] }
  0xd3   :  { %v1083_v50 = vpop.f32.mrf.mxu1 }
  0xd4   :  { %v1179_v30 = vpop.f32.mrf.mxu3  ;;  %v1084_v12 = vadd.f32 %v1083_v50, %v1035_v18  ;;  %v4082_v18 = vor.u32 %v2905_v31, %v2218_v56 }
  0xd5   :  { %v1180_v36 = vadd.f32 %v1179_v30, %v1131_v24 }
  0xd6   :  { %v1230_v62 = vpop.f32.mrf.mxu0  ;;  %4724 = vst [vmem:[#allocation20_spill] sm:$0xff] %v4082_v18 }
  0xd7   :  { %v4065_v38 = vadd.f32 %v1228_v14, %v1180_v36  ;;  %v1038_v36 = vadd.f32 %v1037_v29, %v3955_v13  ;;  %v2988_v29 = vld [vmem:[%s4694_s1 + $0x144] sm:$0xf] }
  0xd8   :  { %v2555_v34 = vor.u32 %v2988_v29, %v2552_v28  ;;  %v1043_v28 = vadd.f32 %v3919_v52, %v3955_v13  ;;  %v2986_v52 = vld [vmem:[%s4694_s1 + $0x134] sm:$0xf] }
  0xd9   :  { %v1132_v9 = vpop.f32.mrf.mxu2 }
  0xda   :  { %v1133_v60 = vadd.f32 %v1132_v9, %v1084_v12  ;;  %1467 = vmatpush.bf16.msrb.mxu1 %v2555_v34 }
  0xdb   :  { %v1086_v2 = vpop.f32.mrf.mxu1 }
  0xdc   :  { %v1181_v14 = vpop.f32.mrf.mxu3  ;;  %v1087_v24 = vadd.f32 %v1086_v2, %v1038_v36 }
  0xdd   :  { %v1182_v30 = vadd.f32 %v1181_v14, %v1133_v60 }
  0xde   :  { %1281 = vmatmul.bf16.gmra.mxu1 %v4080_v15  ;;  %2781 = vmatmul.msk.bf16.gmra.mxu2 %vm998_vm0, %v4082_v18  ;;  %v1233_v12 = vpop.f32.mrf.mxu0 }
  0xdf   :  { %v4084_v50 = vadd.f32 %v1230_v62, %v1182_v30  ;;  %v1040_v62 = vadd.f32 %v1039_v0, %v3955_v13  ;;  %v2908_v30 = vld [vmem:[%s4693_s0 + $0x84] sm:$0xf]  ;;  %v2240_v0 = vld [vmem:[%s4693_s0 + $0x9c] sm:$0xf0] }
  0xe1   :  { %1379 = vmatmul.bf16.gmra.mxu3 %v3506_v61  ;;  %v1135_v56 = vpop.f32.mrf.mxu2  ;;  %1428 = vmatmul.bf16.gmra.mxu0 %v3618_v53  ;;  %v2912_v53 = vld [vmem:[%s4693_s0 + $0xa0] sm:$0xf0] }
  0xe2   :  { %v1136_v31 = vadd.f32 %v1135_v56, %v1087_v24  ;;  %v2246_v24 = vld [vmem:[%s4693_s0 + $0x88] sm:$0xf] }
  0xe3   :  { %v1088_v9 = vpop.f32.mrf.mxu1  ;;  %v4116_v56 = vor.u32 %v2912_v53, %v2246_v24 }
  0xe4   :  { %v1184_v36 = vpop.f32.mrf.mxu3  ;;  %v1089_v60 = vadd.f32 %v1088_v9, %v1040_v62  ;;  %v4114_v62 = vor.u32 %v2908_v30, %v2240_v0 }
  0xe5   :  { %v1185_v14 = vadd.f32 %v1184_v36, %v1136_v31  ;;  %4725 = vst [vmem:[#allocation21_spill] sm:$0xff] %v4116_v56 }
  0xe6   :  { %v1235_v61 = vpop.f32.mrf.mxu0 }
  0xe7   :  { %v4098_v2 = vadd.f32 %v1233_v12, %v1185_v14 }
  0xe9   :  { %v1137_v29 = vpop.f32.mrf.mxu2 }
  0xea   :  { %v1138_v12 = vadd.f32 %v1137_v29, %v1089_v60  ;;  %v2544_v60 = vld [vmem:[%s4694_s1 + $0x138] sm:$0xf0] }
  0xeb   :  { %v1091_v31 = vpop.f32.mrf.mxu1  ;;  %v2547_v0 = vor.u32 %v2986_v52, %v2544_v60  ;;  %v2268_v52 = vld [vmem:[%s4693_s0 + $0xd4] sm:$0xf0]  ;;  %v1048_v60 = vadd.f32 %v3997_v5, %v3955_v13  ;;  %v2984_v5 = vld [vmem:[%s4694_s1 + $0x124] sm:$0xf] }
  0xec   :  { %v1186_v34 = vpop.f32.mrf.mxu3  ;;  %v1092_v36 = vadd.f32 %v1091_v31, %v1043_v28 }
  0xed   :  { %v1187_v9 = vadd.f32 %v1186_v34, %v1138_v12  ;;  %1468 = vmatpush.bf16.msrb.mxu1 %v2547_v0 }
  0xee   :  { %1286 = vmatmul.bf16.gmra.mxu1 %v4114_v62  ;;  %2782 = vmatmul.msk.bf16.gmra.mxu2 %vm998_vm0, %v4116_v56  ;;  %v1238_v30 = vpop.f32.mrf.mxu0 }
  0xef   :  { %v4118_v14 = vadd.f32 %v1235_v61, %v1187_v9  ;;  %v1045_v61 = vadd.f32 %v3967_v25, %v3955_v13  ;;  %v2274_v25 = vld [vmem:[%s4693_s0 + $0xc0] sm:$0xf] }
  0xf1   :  { %1384 = vmatmul.bf16.gmra.mxu3 %v3333_v44  ;;  %v1140_v24 = vpop.f32.mrf.mxu2  ;;  %1433 = vmatmul.bf16.gmra.mxu0 %v3660_v6  ;;  %v2915_v44 = vld [vmem:[%s4693_s0 + $0xbc] sm:$0xf] }
  0xf2   :  { %v1141_v53 = vadd.f32 %v1140_v24, %v1092_v36  ;;  %v2919_v6 = vld [vmem:[%s4693_s0 + $0xd8] sm:$0xf0]  ;;  %v4149_v24 = vor.u32 %v2915_v44, %v2268_v52 }
  0xf3   :  { %v1093_v28 = vpop.f32.mrf.mxu1 }
  0xf4   :  { %v1189_v29 = vpop.f32.mrf.mxu3  ;;  %v1094_v12 = vadd.f32 %v1093_v28, %v1045_v61  ;;  %v4151_v61 = vor.u32 %v2919_v6, %v2274_v25 }
  0xf5   :  { %v1190_v34 = vadd.f32 %v1189_v29, %v1141_v53 }
  0xf6   :  { %v1240_v9 = vpop.f32.mrf.mxu0  ;;  %4726 = vst [vmem:[#allocation22_spill] sm:$0xff] %v4151_v61 }
  0xf7   :  { %v4133_v31 = vadd.f32 %v1238_v30, %v1190_v34 }
  0xf9   :  { %v1142_v36 = vpop.f32.mrf.mxu2 }
  0xfa   :  { %v1143_v30 = vadd.f32 %v1142_v36, %v1094_v12  ;;  %v2536_v12 = vld [vmem:[%s4694_s1 + $0x128] sm:$0xf0] }
  0xfb   :  { %v1096_v53 = vpop.f32.mrf.mxu1  ;;  %v2539_v52 = vor.u32 %v2984_v5, %v2536_v12  ;;  %v2296_v5 = vld [vmem:[%s4693_s0 + $0x10c] sm:$0xf0] }
  0xfc   :  { %v1191_v0 = vpop.f32.mrf.mxu3  ;;  %v1097_v29 = vadd.f32 %v1096_v53, %v1048_v60 }
  0xfd   :  { %v1192_v28 = vadd.f32 %v1191_v0, %v1143_v30  ;;  %1469 = vmatpush.bf16.msrb.mxu1 %v2539_v52 }
  0xfe   :  { %1291 = vmatmul.bf16.gmra.mxu1 %v4149_v24  ;;  %2783 = vmatmul.msk.bf16.gmra.mxu2 %vm998_vm0, %v4151_v61  ;;  %v1243_v44 = vpop.f32.mrf.mxu0 }
  0xff   :  { %v4153_v34 = vadd.f32 %v1240_v9, %v1192_v28  ;;  %v1050_v9 = vadd.f32 %v4025_v57, %v3955_v13  ;;  %v2302_v13 = vld [vmem:[%s4693_s0 + $0xf8] sm:$0xf] }
 0x101   :  { %1389 = vmatmul.bf16.gmra.mxu3 %v3465_v40  ;;  %v1145_v25 = vpop.f32.mrf.mxu2  ;;  %1438 = vmatmul.bf16.gmra.mxu0 %v3702_v21  ;;  %v2922_v40 = vld [vmem:[%s4693_s0 + $0xf4] sm:$0xf] }
 0x102   :  { %v1146_v6 = vadd.f32 %v1145_v25, %v1097_v29  ;;  %v2926_v21 = vld [vmem:[%s4693_s0 + $0x110] sm:$0xf0] }
 0x103   :  { %v1098_v60 = vpop.f32.mrf.mxu1  ;;  %v4184_v52 = vor.u32 %v2926_v21, %v2302_v13  ;;  %v2704_v13 = vld [vmem:[%s4694_s1 + $0x278] sm:$0xf0] }
 0x104   :  { %v1194_v36 = vpop.f32.mrf.mxu3  ;;  %v1099_v30 = vadd.f32 %v1098_v60, %v1050_v9  ;;  %v2640_v60 = vld [vmem:[%s4694_s1 + $0x1f8] sm:$0xf0] }
 0x105   :  { %v1195_v0 = vadd.f32 %v1194_v36, %v1146_v6  ;;  %4727 = vst [vmem:[#allocation23_spill] sm:$0xff] %v4184_v52  ;;  %v3010_v36 = vld [vmem:[%s4694_s1 + $0x1f4] sm:$0xf] }
 0x106   :  { %v1245_v28 = vpop.f32.mrf.mxu0 }
 0x107   :  { %v4168_v53 = vadd.f32 %v1243_v44, %v1195_v0  ;;  %v4182_v44 = vor.u32 %v2922_v40, %v2296_v5  ;;  %v2643_v0 = vor.u32 %v3010_v36, %v2640_v60  ;;  %v3026_v40 = vld [vmem:[%s4694_s1 + $0x274] sm:$0xf]  ;;  %v3024_v36 = vld [vmem:[%s4694_s1 + $0x264] sm:$0xf]  ;;  %v2696_v60 = vld [vmem:[%s4694_s1 + $0x268] sm:$0xf0] }
 0x108   :  { %v2707_v21 = vor.u32 %v3026_v40, %v2704_v13  ;;  %v2324_v13 = vld [vmem:[%s4693_s0 + $0x144] sm:$0xf0] }
 0x109   :  { %v1147_v57 = vpop.f32.mrf.mxu2  ;;  %1513 = vmatpush.bf16.msrb.mxu2 %v2643_v0 }
 0x10a   :  { %v1148_v29 = vadd.f32 %v1147_v57, %v1099_v30  ;;  %v2528_v30 = vld [vmem:[%s4694_s1 + $0x118] sm:$0xf0]  ;;  %v3008_v57 = vld [vmem:[%s4694_s1 + $0x1e4] sm:$0xf]  ;;  %1562 = vmatpush.bf16.msrb.mxu3 %v2707_v21 }
 0x10b   :  { %v1101_v25 = vpop.f32.mrf.mxu1 }
 0x10c   :  { %v1196_v12 = vpop.f32.mrf.mxu3  ;;  %v1102_v9 = vadd.f32 %v1101_v25, %v3958_v16  ;;  %v2982_v16 = vld [vmem:[%s4694_s1 + $0x114] sm:$0xf] }
 0x10d   :  { %v1197_v6 = vadd.f32 %v1196_v12, %v1148_v29  ;;  %v2531_v5 = vor.u32 %v2982_v16, %v2528_v30  ;;  %v2632_v29 = vld [vmem:[%s4694_s1 + $0x1e8] sm:$0xf0]  ;;  %v2699_v16 = vor.u32 %v3024_v36, %v2696_v60  ;;  %v2768_v36 = vld [vmem:[%s4694_s1 + $0x2f8] sm:$0xf0] }
 0x10e   :  { %1296 = vmatmul.bf16.gmra.mxu1 %v4182_v44  ;;  %2784 = vmatmul.msk.bf16.gmra.mxu2 %vm998_vm0, %v4184_v52  ;;  %v2635_v25 = vor.u32 %v3008_v57, %v2632_v29  ;;  %v2688_v29 = vld [vmem:[%s4694_s1 + $0x258] sm:$0xf0] }
 0x10f   :  { %v4193_v61 = vadd.f32 %v1245_v28, %v1197_v6  ;;  %v1248_v28 = vpop.f32.mrf.mxu0  ;;  %1470 = vmatpush.bf16.msrb.mxu1 %v2531_v5  ;;  %v2929_v5 = vld [vmem:[%s4693_s0 + $0x12c] sm:$0xf]  ;;  %1563 = vmatpush.bf16.msrb.mxu3 %v2699_v16 }
 0x110   :  { %1514 = vmatpush.bf16.msrb.mxu2 %v2635_v25  ;;  %v2616_v16 = vld [vmem:[%s4694_s1 + $0x1c8] sm:$0xf0]  ;;  %v4263_v56 = vor.u32 %v2929_v5, %v2324_v13 }
 0x111   :  { %1394 = vmatmul.bf16.gmra.mxu3 %v3335_v45  ;;  %v1150_v12 = vpop.f32.mrf.mxu2  ;;  %1443 = vmatmul.bf16.gmra.mxu0 %v3744_v42  ;;  %v2624_v42 = vld [vmem:[%s4694_s1 + $0x1d8] sm:$0xf0]  ;;  %v2760_v5 = vld [vmem:[%s4694_s1 + $0x2e8] sm:$0xf0] }
 0x112   :  { %v1151_v45 = vadd.f32 %v1150_v12, %v1102_v9  ;;  %v3006_v9 = vld [vmem:[%s4694_s1 + $0x1d4] sm:$0xf] }
 0x113   :  { %v1103_v0 = vpop.f32.mrf.mxu1  ;;  %v2627_v21 = vor.u32 %v3006_v9, %v2624_v42  ;;  %v3042_v12 = vld [vmem:[%s4694_s1 + $0x2f4] sm:$0xf] }
 0x114   :  { %v1199_v6 = vpop.f32.mrf.mxu3  ;;  %v1104_v30 = vadd.f32 %v1103_v0, %v3991_v63  ;;  %v3022_v63 = vld [vmem:[%s4694_s1 + $0x254] sm:$0xf]  ;;  %v2771_v60 = vor.u32 %v3042_v12, %v2768_v36  ;;  %v3004_v0 = vld [vmem:[%s4694_s1 + $0x1c4] sm:$0xf] }
 0x115   :  { %v1200_v40 = vadd.f32 %v1199_v6, %v1151_v45  ;;  %v2330_v45 = vld [vmem:[%s4693_s0 + $0x130] sm:$0xf]  ;;  %1515 = vmatpush.bf16.msrb.mxu2 %v2627_v21  ;;  %v2691_v6 = vor.u32 %v3022_v63, %v2688_v29  ;;  %v2619_v9 = vor.u32 %v3004_v0, %v2616_v16  ;;  %v3020_v63 = vld [vmem:[%s4694_s1 + $0x244] sm:$0xf]  ;;  %v2680_v29 = vld [vmem:[%s4694_s1 + $0x248] sm:$0xf0] }
 0x116   :  { %1611 = vmatpush.bf16.msrb.mxu0 %v2771_v60  ;;  %v3040_v12 = vld [vmem:[%s4694_s1 + $0x2e4] sm:$0xf]  ;;  %v3002_v36 = vld [vmem:[%s4694_s1 + $0x1b4] sm:$0xf]  ;;  %v2608_v60 = vld [vmem:[%s4694_s1 + $0x1b8] sm:$0xf0] }
 0x117   :  { %v4237_v57 = vadd.f32 %v1248_v28, %v1200_v40  ;;  %v1250_v25 = vpop.f32.mrf.mxu0  ;;  %v2933_v28 = vld [vmem:[%s4693_s0 + $0x148] sm:$0xf0]  ;;  %1564 = vmatpush.bf16.msrb.mxu3 %v2691_v6  ;;  %v2763_v6 = vor.u32 %v3040_v12, %v2760_v5  ;;  %v2611_v16 = vor.u32 %v3002_v36, %v2608_v60 }
 0x118   :  { %v4265_v21 = vor.u32 %v2933_v28, %v2330_v45  ;;  %v2683_v28 = vor.u32 %v3020_v63, %v2680_v29  ;;  %v3038_v63 = vld [vmem:[%s4694_s1 + $0x2d4] sm:$0xf]  ;;  %v2752_v29 = vld [vmem:[%s4694_s1 + $0x2d8] sm:$0xf0]  ;;  %v2600_v5 = vld [vmem:[%s4694_s1 + $0x1a8] sm:$0xf0] }
 0x119   :  { %v1152_v40 = vpop.f32.mrf.mxu2  ;;  %1516 = vmatpush.bf16.msrb.mxu2 %v2619_v9 }
 0x11a   :  { %v1153_v42 = vadd.f32 %v1152_v40, %v1104_v30  ;;  %4728 = vst [vmem:[#allocation24_spill] sm:$0xff] %v4265_v21  ;;  %v3018_v40 = vld [vmem:[%s4694_s1 + $0x234] sm:$0xf]  ;;  %1612 = vmatpush.bf16.msrb.mxu0 %v2763_v6 }
 0x11b   :  { %v1106_v30 = vpop.f32.mrf.mxu1  ;;  %1565 = vmatpush.bf16.msrb.mxu3 %v2683_v28  ;;  %v3016_v28 = vld [vmem:[%s4694_s1 + $0x224] sm:$0xf] }
 0x11c   :  { %v1201_v52 = vpop.f32.mrf.mxu3  ;;  %v1107_v13 = vadd.f32 %v1106_v30, %v4022_v48  ;;  %v2980_v48 = vld [vmem:[%s4694_s1 + $0x104] sm:$0xf]  ;;  %v2755_v30 = vor.u32 %v3038_v63, %v2752_v29  ;;  %v2998_v63 = vld [vmem:[%s4694_s1 + $0x194] sm:$0xf]  ;;  %v2592_v29 = vld [vmem:[%s4694_s1 + $0x198] sm:$0xf0] }
 0x11d   :  { %v1202_v45 = vadd.f32 %v1201_v52, %v1153_v42  ;;  %v2520_v52 = vld [vmem:[%s4694_s1 + $0x108] sm:$0xf0]  ;;  %v2672_v42 = vld [vmem:[%s4694_s1 + $0x238] sm:$0xf0]  ;;  %1517 = vmatpush.bf16.msrb.mxu2 %v2611_v16 }
 0x11e   :  { %1301 = vmatmul.bf16.gmra.mxu1 %v4263_v56  ;;  %2785 = vmatmul.msk.bf16.gmra.mxu2 %vm998_vm0, %v4265_v21  ;;  %v2523_v9 = vor.u32 %v2980_v48, %v2520_v52  ;;  %v2675_v12 = vor.u32 %v3018_v40, %v2672_v42  ;;  %v2664_v48 = vld [vmem:[%s4694_s1 + $0x228] sm:$0xf0]  ;;  %v3036_v52 = vld [vmem:[%s4694_s1 + $0x2c4] sm:$0xf] }
 0x11f   :  { %v4286_v0 = vadd.f32 %v1250_v25, %v1202_v45  ;;  %v1253_v25 = vpop.f32.mrf.mxu0  ;;  %1613 = vmatpush.bf16.msrb.mxu0 %v2755_v30  ;;  %v2667_v40 = vor.u32 %v3016_v28, %v2664_v48  ;;  %v2936_v30 = vld [vmem:[%s4693_s0 + $0x164] sm:$0xf]  ;;  %v2736_v28 = vld [vmem:[%s4694_s1 + $0x2b8] sm:$0xf0] }
 0x120   :  { %1471 = vmatpush.bf16.msrb.mxu1 %v2523_v9  ;;  %1566 = vmatpush.bf16.msrb.mxu3 %v2675_v12 }
 0x121   :  { %1399 = vmatmul.bf16.gmra.mxu3 %v3467_v41  ;;  %v3000_v41 = vld [vmem:[%s4694_s1 + $0x1a4] sm:$0xf]  ;;  %v1155_v45 = vpop.f32.mrf.mxu2  ;;  %1448 = vmatmul.bf16.gmra.mxu0 %v3810_v19 }
 0x122   :  { %v2603_v6 = vor.u32 %v3000_v41, %v2600_v5  ;;  %v1156_v36 = vadd.f32 %v1155_v45, %v1107_v13  ;;  %v2744_v13 = vld [vmem:[%s4694_s1 + $0x2c8] sm:$0xf0]  ;;  %v2595_v41 = vor.u32 %v2998_v63, %v2592_v29  ;;  %v3014_v5 = vld [vmem:[%s4694_s1 + $0x214] sm:$0xf]  ;;  %v2656_v45 = vld [vmem:[%s4694_s1 + $0x218] sm:$0xf0] }
 0x123   :  { %v1108_v16 = vpop.f32.mrf.mxu1  ;;  %v2747_v42 = vor.u32 %v3036_v52, %v2744_v13  ;;  %v2659_v48 = vor.u32 %v3014_v5, %v2656_v45  ;;  %v2584_v13 = vld [vmem:[%s4694_s1 + $0x188] sm:$0xf0]  ;;  %v3032_v5 = vld [vmem:[%s4694_s1 + $0x2a4] sm:$0xf] }
 0x124   :  { %v1204_v60 = vpop.f32.mrf.mxu3  ;;  %v1109_v19 = vadd.f32 %v1108_v16, %v4044_v39  ;;  %1518 = vmatpush.bf16.msrb.mxu2 %v2603_v6  ;;  %v2352_v39 = vld [vmem:[%s4693_s0 + $0x17c] sm:$0xf0]  ;;  %v3034_v6 = vld [vmem:[%s4694_s1 + $0x2b4] sm:$0xf]  ;;  %1567 = vmatpush.bf16.msrb.mxu3 %v2667_v40  ;;  %v2996_v16 = vld [vmem:[%s4694_s1 + $0x184] sm:$0xf] }
 0x125   :  { %v1205_v9 = vadd.f32 %v1204_v60, %v1156_v36  ;;  %v2358_v60 = vld [vmem:[%s4693_s0 + $0x168] sm:$0xf]  ;;  %1614 = vmatpush.bf16.msrb.mxu0 %v2747_v42  ;;  %v2739_v52 = vor.u32 %v3034_v6, %v2736_v28  ;;  %v2587_v63 = vor.u32 %v2996_v16, %v2584_v13  ;;  %v4368_v21 = vor.u32 %v2936_v30, %v2352_v39  ;;  %v3012_v40 = vld [vmem:[%s4694_s1 + $0x204] sm:$0xf]  ;;  %v2728_v30 = vld [vmem:[%s4694_s1 + $0x2a8] sm:$0xf0] }
 0x126   :  { %v3044_v28 = vld [vmem:[%s4694_s1 + $0x304] sm:$0xf]  ;;  %v2720_v16 = vld [vmem:[%s4694_s1 + $0x298] sm:$0xf0] }
 0x127   :  { %v4342_v12 = vadd.f32 %v1253_v25, %v1205_v9  ;;  %v1255_v36 = vpop.f32.mrf.mxu0  ;;  %v2940_v25 = vld [vmem:[%s4693_s0 + $0x180] sm:$0xf0] }
 0x128   :  { %1519 = vmatpush.bf16.msrb.mxu2 %v2595_v41  ;;  %v4370_v18 = vor.u32 %v2940_v25, %v2358_v60  ;;  %v2648_v41 = vld [vmem:[%s4694_s1 + $0x208] sm:$0xf0]  ;;  %1568 = vmatpush.bf16.msrb.mxu3 %v2659_v48  ;;  %v2731_v60 = vor.u32 %v3032_v5, %v2728_v30 }
 0x129   :  { %v1157_v9 = vpop.f32.mrf.mxu2  ;;  %1615 = vmatpush.bf16.msrb.mxu0 %v2739_v52  ;;  %v2776_v52 = vld [vmem:[%s4694_s1 + $0x308] sm:$0xf0] }
 0x12a   :  { %v1158_v29 = vadd.f32 %v1157_v9, %v1109_v19  ;;  %v2651_v19 = vor.u32 %v3012_v40, %v2648_v41  ;;  %v2779_v48 = vor.u32 %v3044_v28, %v2776_v52 }
 0x12b   :  { %v1111_v45 = vpop.f32.mrf.mxu1 }
 0x12c   :  { %v1206_v42 = vpop.f32.mrf.mxu3  ;;  %v1112_v39 = vadd.f32 %v1111_v45, %v3970_v27  ;;  %1520 = vmatpush.bf16.msrb.mxu2 %v2587_v63  ;;  %v3030_v27 = vld [vmem:[%s4694_s1 + $0x294] sm:$0xf]  ;;  %1569 = vmatpush.bf16.msrb.mxu3 %v2651_v19 }
 0x12d   :  { %v1207_v6 = vadd.f32 %v1206_v42, %v1158_v29  ;;  %1616 = vmatpush.bf16.msrb.mxu0 %v2731_v60  ;;  %v2723_v13 = vor.u32 %v3030_v27, %v2720_v16  ;;  %1667 = vmatpush.bf16.msra.mxu1 %v2779_v48  ;;  %v3028_v42 = vld [vmem:[%s4694_s1 + $0x284] sm:$0xf] }
 0x12e   :  { %1306 = vmatmul.bf16.gmra.mxu1 %v4368_v21  ;;  %2786 = vmatmul.msk.bf16.gmra.mxu2 %vm998_vm0, %v4370_v18 }
 0x12f   :  { %v4385_v25 = vadd.f32 %v1255_v36, %v1207_v6  ;;  %v1258_v36 = vpop.f32.mrf.mxu0  ;;  %v2386_v6 = vld [vmem:[%s4693_s0 + $0x1a0] sm:$0xf] }
 0x131   :  { %1404 = vmatmul.bf16.gmra.mxu3 %v3346_v49  ;;  %v1160_v9 = vpop.f32.mrf.mxu2  ;;  %1453 = vmatmul.bf16.gmra.mxu0 %v3906_v35  ;;  %v2712_v49 = vld [vmem:[%s4694_s1 + $0x288] sm:$0xf0]  ;;  %v2943_v35 = vld [vmem:[%s4693_s0 + $0x19c] sm:$0xf] }
 0x132   :  { %v1161_v63 = vadd.f32 %v1160_v9, %v1112_v39  ;;  %1617 = vmatpush.bf16.msrb.mxu0 %v2723_v13  ;;  %v2715_v41 = vor.u32 %v3028_v42, %v2712_v49  ;;  %v2380_v39 = vld [vmem:[%s4693_s0 + $0x1b4] sm:$0xf0] }
 0x133   :  { %v1113_v40 = vpop.f32.mrf.mxu1  ;;  %v4425_v27 = vor.u32 %v2943_v35, %v2380_v39 }
 0x134   :  { %v1209_v29 = vpop.f32.mrf.mxu3  ;;  %v1114_v5 = vadd.f32 %v1113_v40, %v4000_v10  ;;  %v2947_v10 = vld [vmem:[%s4693_s0 + $0x1b8] sm:$0xf0] }
 0x135   :  { %v1210_v45 = vadd.f32 %v1209_v29, %v1161_v63 }
 0x136   :  { %1618 = vmatpush.bf16.msrb.mxu0 %v2715_v41 }
 0x137   :  { %v4411_v19 = vadd.f32 %v1258_v36, %v1210_v45  ;;  %v1260_v30 = vpop.f32.mrf.mxu0  ;;  %v4427_v36 = vor.u32 %v2947_v10, %v2386_v6 }
 0x139   :  { %v1162_v60 = vpop.f32.mrf.mxu2 }
 0x13a   :  { %v1163_v28 = vadd.f32 %v1162_v60, %v1114_v5 }
 0x13b   :  { %v1116_v48 = vpop.f32.mrf.mxu1 }
 0x13c   :  { %v1211_v52 = vpop.f32.mrf.mxu3  ;;  %v1117_v16 = vadd.f32 %v1116_v48, %v4028_v59 }
 0x13d   :  { %v1212_v13 = vadd.f32 %v1211_v52, %v1163_v28 }
 0x13e   :  { %1311 = vmatmul.bf16.gmra.mxu1 %v4425_v27  ;;  %2787 = vmatmul.msk.bf16.gmra.mxu2 %vm998_vm0, %v4427_v36 }
 0x13f   :  { %v4430_v9 = vadd.f32 %v1260_v30, %v1212_v13  ;;  %v1263_v63 = vpop.f32.mrf.mxu0 }
 0x141   :  { %1409 = vmatmul.bf16.gmra.mxu3 %v3478_v47  ;;  %v1165_v29 = vpop.f32.mrf.mxu2  ;;  %1458 = vmatmul.bf16.gmra.mxu0 %v3993_v3  ;;  %v4447_v3 = vperm.slane %v3935_v1, 1 }
 0x142   :  { %v1166_v42 = vadd.f32 %v1165_v29, %v1117_v16 }
 0x143   :  { %v1118_v40 = vpop.f32.mrf.mxu1 }
 0x144   :  { %v1214_v49 = vpop.f32.mrf.mxu3  ;;  %v1119_v41 = vadd.f32 %v1118_v40, %v4051_v4 }
 0x145   :  { %v1215_v59 = vadd.f32 %v1214_v49, %v1166_v42 }
 0x147   :  { %v4438_v5 = vadd.f32 %v1263_v63, %v1215_v59  ;;  %v1265_v45 = vpop.f32.mrf.mxu0 }
 0x149   :  { %v1167_v35 = vpop.f32.mrf.mxu2 }
 0x14a   :  { %v1168_v30 = vadd.f32 %v1167_v35, %v1119_v41 }
 0x14b   :  { %v1277_v6 = vpop.f32.mrf.mxu1 }
 0x14c   :  { %v1216_v39 = vpop.f32.mrf.mxu3  ;;  %v1278_v47 = vadd.f32 %v1277_v6, %v4065_v38 }
 0x14d   :  { %v1217_v10 = vadd.f32 %v1216_v39, %v1168_v30 }
 0x14e   :  { %1472 = vmatmul.bf16.vlgmr.msrb.gmra.mxu1 %v3578_v32  ;;  %1521 = vmatmul.bf16.vlgmr.msrb.gmra.mxu2 %v3580_v33 }
 0x14f   :  { %v4441_v60 = vadd.f32 %v1265_v45, %v1217_v10  ;;  %v1424_v4 = vpop.f32.mrf.mxu0 }
 0x151   :  { %1570 = vmatmul.bf16.vlgmr.msrb.gmra.mxu3 %v3590_v37  ;;  %v1326_v28 = vpop.f32.mrf.mxu2  ;;  %1619 = vmatmul.bf16.vlgmr.msrb.gmra.mxu0 %v4046_v17 }
 0x152   :  { %v1327_v52 = vadd.f32 %v1326_v28, %v1278_v47 }
 0x153   :  { %v1279_v16 = vpop.f32.mrf.mxu1 }
 0x154   :  { %v1375_v48 = vpop.f32.mrf.mxu3  ;;  %v1280_v13 = vadd.f32 %v1279_v16, %v4084_v50  ;;  %v1709_v49 = vmax.f32 %v1327_v52, 0.0 }
 0x155   :  { %v1376_v38 = vadd.f32 %v1375_v48, %v4447_v3 }
 0x157   :  { %v4452_v63 = vadd.f32 %v1424_v4, %v1376_v38  ;;  %v1426_v32 = vpop.f32.mrf.mxu0 }
 0x159   :  { %v1328_v33 = vpop.f32.mrf.mxu2 }
 0x15a   :  { %v1329_v29 = vadd.f32 %v1328_v33, %v1280_v13 }
 0x15b   :  { %v1282_v42 = vpop.f32.mrf.mxu1 }
 0x15c   :  { %v1377_v37 = vpop.f32.mrf.mxu3  ;;  %v1711_v40 = vmax.f32 %v1329_v29, 0.0  ;;  %v1283_v41 = vadd.f32 %v1282_v42, %v4098_v2 }
 0x15d   :  { %v1378_v1 = vadd.f32 %v1377_v37, %v4447_v3 }
 0x15e   :  { %v4458_v17 = vpack.c.bf16 %v1711_v40, %v1709_v49  ;;  %1477 = vmatmul.bf16.gmra.mxu1 %v3620_v54  ;;  %1526 = vmatmul.bf16.gmra.mxu2 %v3622_v55 }
 0x15f   :  { %v4456_v59 = vadd.f32 %v1426_v32, %v1378_v1  ;;  %v1429_v50 = vpop.f32.mrf.mxu0 }
 0x161   :  { %1575 = vmatmul.bf16.gmra.mxu3 %v3632_v58  ;;  %v1331_v45 = vpop.f32.mrf.mxu2  ;;  %1624 = vmatmul.bf16.gmra.mxu0 %v4080_v15 }
 0x162   :  { %v1332_v35 = vadd.f32 %v1331_v45, %v1283_v41 }
 0x163   :  { %v1284_v39 = vpop.f32.mrf.mxu1 }
 0x164   :  { %v1380_v30 = vpop.f32.mrf.mxu3  ;;  %v1285_v2 = vadd.f32 %v1284_v39, %v4118_v14  ;;  %v1713_v52 = vmax.f32 %v1332_v35, 0.0 }
 0x165   :  { %v1381_v6 = vadd.f32 %v1380_v30, %v4447_v3 }
 0x167   :  { %v4466_v10 = vadd.f32 %v1429_v50, %v1381_v6  ;;  %v1431_v47 = vpop.f32.mrf.mxu0 }
 0x169   :  { %v1333_v4 = vpop.f32.mrf.mxu2 }
 0x16a   :  { %v1334_v54 = vadd.f32 %v1333_v4, %v1285_v2 }
 0x16b   :  { %v1287_v55 = vpop.f32.mrf.mxu1 }
 0x16c   :  { %v1382_v28 = vpop.f32.mrf.mxu3  ;;  %v1715_v48 = vmax.f32 %v1334_v54, 0.0  ;;  %v1288_v16 = vadd.f32 %v1287_v55, %v4133_v31 }
 0x16d   :  { %v1383_v58 = vadd.f32 %v1382_v28, %v4447_v3 }
 0x16e   :  { %1482 = vmatmul.bf16.gmra.mxu1 %v3662_v7  ;;  %1531 = vmatmul.bf16.gmra.mxu2 %v3664_v8  ;;  %v4474_v15 = vpack.c.bf16 %v1715_v48, %v1713_v52 }
 0x16f   :  { %v4470_v38 = vadd.f32 %v1431_v47, %v1383_v58  ;;  %v1434_v14 = vpop.f32.mrf.mxu0 }
 0x171   :  { %1580 = vmatmul.bf16.gmra.mxu3 %v3674_v11  ;;  %v1336_v13 = vpop.f32.mrf.mxu2  ;;  %1629 = vmatmul.bf16.gmra.mxu0 %v4114_v62 }
 0x172   :  { %v1337_v32 = vadd.f32 %v1336_v13, %v1288_v16 }
 0x173   :  { %v1289_v29 = vpop.f32.mrf.mxu1 }
 0x174   :  { %v1385_v33 = vpop.f32.mrf.mxu3  ;;  %v1290_v31 = vadd.f32 %v1289_v29, %v4153_v34  ;;  %v1717_v41 = vmax.f32 %v1337_v32, 0.0  ;;  %v3052_v32 = vld [vmem:[#allocation2 + $0x30] sm:$0xff] }
 0x175   :  { %v1386_v37 = vadd.f32 %v1385_v33, %v4447_v3 }
 0x177   :  { %v4480_v42 = vadd.f32 %v1434_v14, %v1386_v37  ;;  %v1436_v7 = vpop.f32.mrf.mxu0 }
 0x179   :  { %v1338_v1 = vpop.f32.mrf.mxu2 }
 0x17a   :  { %v1339_v8 = vadd.f32 %v1338_v1, %v1290_v31  ;;  %v3050_v1 = vld [vmem:[#allocation2 + $0x20] sm:$0xff] }
 0x17b   :  { %v1292_v40 = vpop.f32.mrf.mxu1 }
 0x17c   :  { %v1387_v49 = vpop.f32.mrf.mxu3  ;;  %v1719_v50 = vmax.f32 %v1339_v8, 0.0  ;;  %v1293_v45 = vadd.f32 %v1292_v40, %v4168_v53 }
 0x17d   :  { %v1388_v11 = vadd.f32 %v1387_v49, %v4447_v3 }
 0x17e   :  { %1487 = vmatmul.bf16.gmra.mxu1 %v3704_v22  ;;  %1536 = vmatmul.bf16.gmra.mxu2 %v3706_v23  ;;  %v4488_v62 = vpack.c.bf16 %v1719_v50, %v1717_v41  ;;  %v3049_v50 = vld [vmem:[#allocation2 + $0x18] sm:$0xff] }
 0x17f   :  { %v4484_v35 = vadd.f32 %v1436_v7, %v1388_v11  ;;  %v1439_v34 = vpop.f32.mrf.mxu0 }
 0x181   :  { %1585 = vmatmul.bf16.gmra.mxu3 %v3716_v26  ;;  %v1341_v30 = vpop.f32.mrf.mxu2  ;;  %1634 = vmatmul.bf16.gmra.mxu0 %v4149_v24  ;;  %v3053_v24 = vld [vmem:[#allocation2 + $0x38] sm:$0xff] }
 0x182   :  { %v1342_v39 = vadd.f32 %v1341_v30, %v1293_v45  ;;  %1889 = vmatpush.bf16.msra.mxu2 %v3053_v24 }
 0x183   :  { %v1294_v2 = vpop.f32.mrf.mxu1 }
 0x184   :  { %v1390_v6 = vpop.f32.mrf.mxu3  ;;  %v1295_v53 = vadd.f32 %v1294_v2, %v4193_v61  ;;  %v1721_v58 = vmax.f32 %v1342_v39, 0.0 }
 0x185   :  { %v1391_v47 = vadd.f32 %v1390_v6, %v4447_v3  ;;  %v3048_v6 = vld [vmem:[#allocation2 + $0x10] sm:$0xff] }
 0x186   :  { %1890 = vmatpush.bf16.msra.mxu2 %v3052_v32  ;;  %v4733_v32 = vld [vmem:[#allocation15_spill] sm:$0xff] }
 0x187   :  { %v4494_v4 = vadd.f32 %v1439_v34, %v1391_v47  ;;  %v1441_v22 = vpop.f32.mrf.mxu0  ;;  %v4730_v34 = vld [vmem:[#allocation12_spill] sm:$0xff] }
 0x189   :  { %v1343_v54 = vpop.f32.mrf.mxu2 }
 0x18a   :  { %v1344_v23 = vadd.f32 %v1343_v54, %v1295_v53  ;;  %v3047_v54 = vld [vmem:[#allocation2 + $0x8] sm:$0xff] }
 0x18b   :  { %v1297_v55 = vpop.f32.mrf.mxu1 }
 0x18c   :  { %v1392_v28 = vpop.f32.mrf.mxu3  ;;  %v1723_v52 = vmax.f32 %v1344_v23, 0.0  ;;  %v1298_v48 = vadd.f32 %v1297_v55, %v4237_v57  ;;  %v3046_v55 = vld [vmem:[#allocation2] sm:$0xff] }
 0x18d   :  { %v1393_v26 = vadd.f32 %v1392_v28, %v4447_v3 }
 0x18e   :  { %1492 = vmatmul.bf16.gmra.mxu1 %v3746_v43  ;;  %1541 = vmatmul.bf16.gmra.mxu2 %v3748_v46  ;;  %v4502_v61 = vpack.c.bf16 %v1723_v52, %v1721_v58  ;;  %v3051_v46 = vld [vmem:[#allocation2 + $0x28] sm:$0xff] }
 0x18f   :  { %v4498_v16 = vadd.f32 %v1441_v22, %v1393_v26  ;;  %v1444_v14 = vpop.f32.mrf.mxu0  ;;  %1891 = vmatpush.bf16.msra.mxu2 %v3051_v46 }
 0x191   :  { %1590 = vmatmul.bf16.gmra.mxu3 %v3758_v51  ;;  %v1346_v13 = vpop.f32.mrf.mxu2  ;;  %1639 = vmatmul.bf16.gmra.mxu0 %v4182_v44 }
 0x192   :  { %v1347_v33 = vadd.f32 %v1346_v13, %v1298_v48 }
 0x193   :  { %v1299_v57 = vpop.f32.mrf.mxu1  ;;  %1892 = vmatpush.bf16.msra.mxu2 %v3050_v1 }
 0x194   :  { %v1395_v29 = vpop.f32.mrf.mxu3  ;;  %v1300_v43 = vadd.f32 %v1299_v57, %v4286_v0  ;;  %v1725_v44 = vmax.f32 %v1347_v33, 0.0  ;;  %v4729_v0 = vld [vmem:[#allocation11_spill] sm:$0xff] }
 0x195   :  { %v1396_v37 = vadd.f32 %v1395_v29, %v4447_v3 }
 0x197   :  { %v4508_v31 = vadd.f32 %v1444_v14, %v1396_v37  ;;  %v4510_v7 = vpop.f32.mrf.mxu0  ;;  %1893 = vmatpush.bf16.msra.mxu2 %v3049_v50  ;;  %v4731_v14 = vld [vmem:[#allocation13_spill] sm:$0xff] }
 0x199   :  { %v1348_v51 = vpop.f32.mrf.mxu2 }
 0x19a   :  { %v1349_v8 = vadd.f32 %v1348_v51, %v1300_v43 }
 0x19b   :  { %v1302_v40 = vpop.f32.mrf.mxu1  ;;  %1894 = vmatpush.bf16.msra.mxu2 %v3048_v6 }
 0x19c   :  { %v4512_v49 = vpop.f32.mrf.mxu3  ;;  %v1727_v11 = vmax.f32 %v1349_v8, 0.0  ;;  %v1303_v41 = vadd.f32 %v1302_v40, %v4342_v12 }
 0x19e   :  { %1497 = vmatmul.bf16.gmra.mxu1 %v3812_v20  ;;  %1546 = vmatmul.bf16.gmra.mxu2 %v4729_v0  ;;  %v4517_v45 = vpack.c.bf16 %v1727_v11, %v1725_v44  ;;  %v3061_v11 = vld [vmem:[#allocation2 + $0x78] sm:$0xff] }
 0x19f   :  { %v1449_v30 = vpop.f32.mrf.mxu0  ;;  %1895 = vmatpush.bf16.msra.mxu2 %v3047_v54  ;;  %1938 = vmatpush.bf16.msra.mxu3 %v3061_v11 }
 0x1a1   :  { %1595 = vmatmul.bf16.gmra.mxu3 %v4730_v34  ;;  %v1351_v39 = vpop.f32.mrf.mxu2  ;;  %1644 = vmatmul.bf16.gmra.mxu0 %v4263_v56 }
 0x1a2   :  { %v1352_v2 = vadd.f32 %v1351_v39, %v1303_v41  ;;  %v4736_v39 = vld [vmem:[#allocation18_spill] sm:$0xff] }
 0x1a3   :  { %v1304_v53 = vpop.f32.mrf.mxu1  ;;  %1896 = vmatpush.bf16.msra.mxu2 %v3046_v55 }
 0x1a4   :  { %v1400_v47 = vpop.f32.mrf.mxu3  ;;  %v1305_v20 = vadd.f32 %v1304_v53, %v4385_v25  ;;  %v1729_v56 = vmax.f32 %v1352_v2, 0.0  ;;  %v4732_v25 = vld [vmem:[#allocation14_spill] sm:$0xff] }
 0x1a5   :  { %v1401_v12 = vadd.f32 %v1400_v47, %v4447_v3 }
 0x1a7   :  { %v4523_v22 = vadd.f32 %v1449_v30, %v1401_v12  ;;  %v4525_v23 = vpop.f32.mrf.mxu0  ;;  %v4735_v30 = vld [vmem:[#allocation17_spill] sm:$0xff] }
 0x1a9   :  { %v1353_v28 = vpop.f32.mrf.mxu2 }
 0x1aa   :  { %v1354_v26 = vadd.f32 %v1353_v28, %v1305_v20 }
 0x1ab   :  { %v1307_v52 = vpop.f32.mrf.mxu1 }
 0x1ac   :  { %v4527_v58 = vpop.f32.mrf.mxu3  ;;  %v1731_v48 = vmax.f32 %v1354_v26, 0.0  ;;  %v1308_v24 = vadd.f32 %v1307_v52, %v4411_v19  ;;  %v3060_v26 = vld [vmem:[#allocation2 + $0x70] sm:$0xff] }
 0x1ad   :  { %1939 = vmatpush.bf16.msra.mxu3 %v3060_v26 }
 0x1ae   :  { %1502 = vmatmul.bf16.gmra.mxu1 %v4731_v14  ;;  %1551 = vmatmul.bf16.gmra.mxu2 %v4732_v25  ;;  %v4532_v13 = vpack.c.bf16 %v1731_v48, %v1729_v56  ;;  %v4737_v14 = vld [vmem:[#allocation19_spill] sm:$0xff] }
 0x1af   :  { %v1454_v33 = vpop.f32.mrf.mxu0 }
 0x1b1   :  { %1600 = vmatmul.bf16.gmra.mxu3 %v4733_v32  ;;  %v1356_v29 = vpop.f32.mrf.mxu2  ;;  %1649 = vmatmul.bf16.gmra.mxu0 %v4368_v21  ;;  %v4734_v21 = vld [vmem:[#allocation16_spill] sm:$0xff] }
 0x1b2   :  { %v1357_v57 = vadd.f32 %v1356_v29, %v1308_v24 }
 0x1b3   :  { %v1309_v43 = vpop.f32.mrf.mxu1 }
 0x1b4   :  { %v1405_v37 = vpop.f32.mrf.mxu3  ;;  %v1310_v51 = vadd.f32 %v1309_v43, %v4430_v9  ;;  %v1733_v50 = vmax.f32 %v1357_v57, 0.0  ;;  %v3059_v57 = vld [vmem:[#allocation2 + $0x68] sm:$0xff] }
 0x1b5   :  { %v1406_v46 = vadd.f32 %v1405_v37, %v4447_v3  ;;  %1940 = vmatpush.bf16.msra.mxu3 %v3059_v57  ;;  %v4738_v43 = vld [vmem:[#allocation20_spill] sm:$0xff] }
 0x1b7   :  { %v4538_v19 = vadd.f32 %v1454_v33, %v1406_v46  ;;  %v4542_v44 = vpop.f32.mrf.mxu0 }
 0x1b9   :  { %v1358_v1 = vpop.f32.mrf.mxu2 }
 0x1ba   :  { %v1359_v8 = vadd.f32 %v1358_v1, %v1310_v51 }
 0x1bb   :  { %v1312_v41 = vpop.f32.mrf.mxu1 }
 0x1bc   :  { %v4540_v40 = vpop.f32.mrf.mxu3  ;;  %v1735_v0 = vmax.f32 %v1359_v8, 0.0  ;;  %v1313_v34 = vadd.f32 %v1312_v41, %v4438_v5  ;;  %v3058_v8 = vld [vmem:[#allocation2 + $0x60] sm:$0xff] }
 0x1bd   :  { %1941 = vmatpush.bf16.msra.mxu3 %v3058_v8 }
 0x1be   :  { %1507 = vmatmul.bf16.gmra.mxu1 %v4734_v21  ;;  %1556 = vmatmul.bf16.gmra.mxu2 %v4735_v30  ;;  %v4547_v9 = vpack.c.bf16 %v1735_v0, %v1733_v50  ;;  %v3057_v21 = vld [vmem:[#allocation2 + $0x58] sm:$0xff] }
 0x1bf   :  { %v1459_v5 = vpop.f32.mrf.mxu0 }
 0x1c1   :  { %1605 = vmatmul.bf16.gmra.mxu3 %v4736_v39  ;;  %v1361_v6 = vpop.f32.mrf.mxu2  ;;  %1654 = vmatmul.bf16.gmra.mxu0 %v4425_v27 }
 0x1c2   :  { %v1362_v2 = vadd.f32 %v1361_v6, %v1313_v34  ;;  %1942 = vmatpush.bf16.msra.mxu3 %v3057_v21 }
 0x1c3   :  { %v1314_v53 = vpop.f32.mrf.mxu1 }
 0x1c4   :  { %v1410_v47 = vpop.f32.mrf.mxu3  ;;  %v1315_v20 = vadd.f32 %v1314_v53, %v4441_v60  ;;  %v1737_v56 = vmax.f32 %v1362_v2, 0.0 }
 0x1c5   :  { %v1411_v12 = vadd.f32 %v1410_v47, %v4447_v3 }
 0x1c7   :  { %v4553_v54 = vadd.f32 %v1459_v5, %v1411_v12  ;;  %v3055_v5 = vld [vmem:[#allocation2 + $0x48] sm:$0xff] }
 0x1c9   :  { %v1363_v28 = vpop.f32.mrf.mxu2 }
 0x1ca   :  { %v1364_v55 = vadd.f32 %v1363_v28, %v1315_v20 }
 0x1cb   :  { %v1473_v52 = vpop.f32.mrf.mxu1 }
 0x1cc   :  { %v1739_v48 = vmax.f32 %v1364_v55, 0.0  ;;  %v1474_v24 = vadd.f32 %v1473_v52, %v4452_v63  ;;  %v4742_v55 = vld [vmem:[#allocation24_spill] sm:$0xff] }
 0x1ce   :  { %2788 = vmatmul.msk.bf16.vlgmr.msra.gmra.mxu1 %vm998_vm0, %v4737_v14  ;;  %1897 = vmatmul.bf16.vlgmr.msra.gmra.mxu2 %v4458_v17  ;;  %v4559_v27 = vpack.c.bf16 %v1739_v48, %v1737_v56  ;;  %v3054_v56 = vld [vmem:[#allocation2 + $0x40] sm:$0xff] }
 0x1d1   :  { %v1522_v60 = vpop.f32.mrf.mxu2 }
 0x1d2   :  { %v4561_v25 = vadd.f32 %v1522_v60, %v1474_v24 }
 0x1d3   :  { %v1475_v32 = vpop.f32.mrf.mxu1 }
 0x1d4   :  { %v4564_v33 = vadd.f32 %v1475_v32, %v4456_v59 }
 0x1d9   :  { %v4566_v29 = vpop.f32.mrf.mxu2 }
 0x1db   :  { %v1478_v37 = vpop.f32.mrf.mxu1 }
 0x1dc   :  { %v1479_v63 = vadd.f32 %v1478_v37, %v4466_v10  ;;  %v4739_v10 = vld [vmem:[#allocation21_spill] sm:$0xff] }
 0x1de   :  { %2789 = vmatmul.msk.bf16.gmra.mxu1 %vm998_vm0, %v4738_v43  ;;  %1902 = vmatmul.bf16.gmra.mxu2 %v4474_v15 }
 0x1e1   :  { %v1527_v17 = vpop.f32.mrf.mxu2 }
 0x1e2   :  { %v4572_v46 = vadd.f32 %v1527_v17, %v1479_v63 }
 0x1e3   :  { %v1480_v51 = vpop.f32.mrf.mxu1 }
 0x1e4   :  { %v4575_v1 = vadd.f32 %v1480_v51, %v4470_v38 }
 0x1e9   :  { %v4577_v59 = vpop.f32.mrf.mxu2 }
 0x1eb   :  { %v1483_v11 = vpop.f32.mrf.mxu1 }
 0x1ec   :  { %v1484_v41 = vadd.f32 %v1483_v11, %v4480_v42  ;;  %v4740_v42 = vld [vmem:[#allocation22_spill] sm:$0xff] }
 0x1ed   :  { %v3069_v11 = vld [vmem:[#allocation5 + $0x38] sm:$0xff] }
 0x1ee   :  { %2790 = vmatmul.msk.bf16.gmra.mxu1 %vm998_vm0, %v4739_v10  ;;  %1907 = vmatmul.bf16.gmra.mxu2 %v4488_v62 }
 0x1ef   :  { %2079 = vmatpush.bf16.msra.mxu0 %v3069_v11 }
 0x1f1   :  { %v1532_v15 = vpop.f32.mrf.mxu2 }
 0x1f2   :  { %v4583_v50 = vadd.f32 %v1532_v15, %v1484_v41 }
 0x1f3   :  { %v1485_v0 = vpop.f32.mrf.mxu1 }
 0x1f4   :  { %v4586_v34 = vadd.f32 %v1485_v0, %v4484_v35  ;;  %v3056_v35 = vld [vmem:[#allocation2 + $0x50] sm:$0xff] }
 0x1f5   :  { %1943 = vmatpush.bf16.msra.mxu3 %v3056_v35  ;;  %v3068_v35 = vld [vmem:[#allocation5 + $0x30] sm:$0xff] }
 0x1f6   :  { %2080 = vmatpush.bf16.msra.mxu0 %v3068_v35 }
 0x1f9   :  { %v4588_v38 = vpop.f32.mrf.mxu2  ;;  %1944 = vmatpush.bf16.msra.mxu3 %v3055_v5 }
 0x1fb   :  { %v1488_v30 = vpop.f32.mrf.mxu1 }
 0x1fc   :  { %v1489_v39 = vadd.f32 %v1488_v30, %v4494_v4  ;;  %v4741_v4 = vld [vmem:[#allocation23_spill] sm:$0xff] }
 0x1fd   :  { %1945 = vmatpush.bf16.msra.mxu3 %v3054_v56 }
 0x1fe   :  { %2791 = vmatmul.msk.bf16.gmra.mxu1 %vm998_vm0, %v4740_v42  ;;  %1912 = vmatmul.bf16.gmra.mxu2 %v4502_v61  ;;  %v4607_v61 = vpop.f32.mrf.mxu3 }
 0x201   :  { %v1537_v62 = vpop.f32.mrf.mxu2 }
 0x202   :  { %v4594_v6 = vadd.f32 %v1537_v62, %v1489_v39 }
 0x203   :  { %v1490_v2 = vpop.f32.mrf.mxu1 }
 0x204   :  { %v4597_v47 = vadd.f32 %v1490_v2, %v4498_v16 }
 0x209   :  { %v1539_v63 = vpop.f32.mrf.mxu2 }
 0x20b   :  { %v1493_v53 = vpop.f32.mrf.mxu1 }
 0x20c   :  { %v4600_v12 = vadd.f32 %v1493_v53, %v4508_v31  ;;  %v4615_v31 = vpop.f32.mrf.mxu0 }
 0x20e   :  { %2792 = vmatmul.msk.bf16.gmra.mxu1 %vm998_vm0, %v4741_v4  ;;  %1917 = vmatmul.bf16.gmra.mxu2 %v4517_v45  ;;  %v1571_v45 = vpop.f32.mrf.mxu3 }
 0x20f   :  { %v1572_v51 = vadd.f32 %v1571_v45, %v4561_v25 }
 0x213   :  { %v4605_v20 = vpop.f32.mrf.mxu1 }
 0x214   :  { %v1620_v52 = vpop.f32.mrf.mxu0 }
 0x215   :  { %v1621_v41 = vadd.f32 %v1620_v52, %v1572_v51 }
 0x21b   :  { %v1498_v28 = vpop.f32.mrf.mxu1 }
 0x21c   :  { %v4610_v16 = vadd.f32 %v1498_v28, %v4523_v22  ;;  %v1573_v22 = vpop.f32.mrf.mxu3  ;;  %v1622_v14 = vpop.f32.mrf.mxu0 }
 0x21e   :  { %2793 = vmatmul.msk.bf16.gmra.mxu1 %vm998_vm0, %v4742_v55  ;;  %1922 = vmatmul.bf16.gmra.mxu2 %v4532_v13 }
 0x223   :  { %v4617_v26 = vpop.f32.mrf.mxu1 }
 0x224   :  { %v1576_v60 = vpop.f32.mrf.mxu3  ;;  %v1625_v37 = vpop.f32.mrf.mxu0 }
 0x225   :  { %v1577_v62 = vadd.f32 %v1576_v60, %v4572_v46 }
 0x227   :  { %v1626_v53 = vadd.f32 %v1625_v37, %v1577_v62  ;;  %v3067_v37 = vld [vmem:[#allocation5 + $0x28] sm:$0xff] }
 0x228   :  { %2081 = vmatpush.bf16.msra.mxu0 %v3067_v37 }
 0x22b   :  { %v1503_v48 = vpop.f32.mrf.mxu1 }
 0x22c   :  { %v4620_v24 = vadd.f32 %v1503_v48, %v4538_v19  ;;  %v1578_v19 = vpop.f32.mrf.mxu3 }
 0x22e   :  { %2794 = vmatmul.msk.bf16.gmra.mxu1 %vm998_vm0, %v4370_v18  ;;  %1927 = vmatmul.bf16.gmra.mxu2 %v4547_v9  ;;  %v1627_v18 = vpop.f32.mrf.mxu0  ;;  %v1525_v9 = vadd.f32 %v4566_v29, %v4564_v33  ;;  %v1530_v33 = vadd.f32 %v4577_v59, %v4575_v1  ;;  %v1535_v1 = vadd.f32 %v4588_v38, %v4586_v34 }
 0x230   :  { %v1579_v2 = vadd.f32 %v1578_v19, %v1530_v33 }
 0x232   :  { %v1628_v5 = vadd.f32 %v1627_v18, %v1579_v2 }
 0x233   :  { %v4625_v13 = vpop.f32.mrf.mxu1 }
 0x234   :  { %v1581_v8 = vpop.f32.mrf.mxu3 }
 0x235   :  { %v1582_v60 = vadd.f32 %v1581_v8, %v4583_v50 }
 0x236   :  { %v1630_v10 = vpop.f32.mrf.mxu0 }
 0x237   :  { %v1631_v18 = vadd.f32 %v1630_v10, %v1582_v60  ;;  %v3066_v10 = vld [vmem:[#allocation5 + $0x20] sm:$0xff] }
 0x238   :  { %2082 = vmatpush.bf16.msra.mxu0 %v3066_v10 }
 0x23b   :  { %v1508_v32 = vpop.f32.mrf.mxu1 }
 0x23c   :  { %v4628_v57 = vadd.f32 %v1508_v32, %v4553_v54  ;;  %v1574_v54 = vadd.f32 %v1573_v22, %v1525_v9  ;;  %v1583_v21 = vpop.f32.mrf.mxu3 }
 0x23d   :  { %v1584_v32 = vadd.f32 %v1583_v21, %v1535_v1 }
 0x23e   :  { %2795 = vmatmul.msk.bf16.gmra.mxu1 %vm998_vm0, %v4427_v36  ;;  %1932 = vmatmul.bf16.gmra.mxu2 %v4559_v27  ;;  %v1623_v15 = vadd.f32 %v1622_v14, %v1574_v54  ;;  %v1632_v29 = vpop.f32.mrf.mxu0  ;;  %v1542_v14 = vpop.f32.mrf.mxu2 }
 0x23f   :  { %v1633_v9 = vadd.f32 %v1632_v29, %v1584_v32 }
 0x243   :  { %v4633_v43 = vpop.f32.mrf.mxu1 }
 0x244   :  { %v1586_v4 = vpop.f32.mrf.mxu3 }
 0x245   :  { %v1587_v50 = vadd.f32 %v1586_v4, %v4594_v6  ;;  %v1543_v6 = vadd.f32 %v1542_v14, %v4600_v12 }
 0x246   :  { %v1635_v52 = vpop.f32.mrf.mxu0 }
 0x24b   :  { %v1669_v17 = vpop.f32.mrf.mxu1 }
 0x24c   :  { %v1670_v36 = vadd.f32 %v1669_v17, %v1621_v41  ;;  %v1588_v59 = vpop.f32.mrf.mxu3  ;;  %v1544_v41 = vpop.f32.mrf.mxu2 }
 0x24e   :  { %v1710_v30 = vmax.f32 %v1670_v36, 0.0  ;;  %v1637_v19 = vpop.f32.mrf.mxu0 }
 0x253   :  { %v1671_v0 = vpop.f32.mrf.mxu1 }
 0x254   :  { %v1672_v27 = vadd.f32 %v1671_v0, %v1623_v15  ;;  %v1591_v54 = vpop.f32.mrf.mxu3  ;;  %v1540_v0 = vadd.f32 %v1539_v63, %v4597_v47 }
 0x256   :  { %v1712_v39 = vmax.f32 %v1672_v27, 0.0  ;;  %v1640_v38 = vpop.f32.mrf.mxu0  ;;  %v1589_v8 = vadd.f32 %v1588_v59, %v1540_v0 }
 0x258   :  { %v1742_v42 = vpack.c.bf16 %v1712_v39, %v1710_v30  ;;  %v1547_v30 = vpop.f32.mrf.mxu2  ;;  %v1636_v39 = vadd.f32 %v1635_v52, %v1587_v50  ;;  %v1638_v33 = vadd.f32 %v1637_v19, %v1589_v8 }
 0x25a   :  { %1946 = vmatmul.bf16.vlgmr.msra.gmra.mxu3 %v1742_v42  ;;  %v1398_v42 = vadd.f32 %v4512_v49, %v4447_v3  ;;  %v1592_v49 = vadd.f32 %v1591_v54, %v1543_v6 }
 0x25b   :  { %v1674_v25 = vpop.f32.mrf.mxu1 }
 0x25c   :  { %v1675_v28 = vadd.f32 %v1674_v25, %v1626_v53  ;;  %v1593_v21 = vpop.f32.mrf.mxu3  ;;  %v1447_v47 = vadd.f32 %v4510_v7, %v1398_v42  ;;  %v1403_v7 = vadd.f32 %v4527_v58, %v4447_v3 }
 0x25e   :  { %v1714_v56 = vmax.f32 %v1675_v28, 0.0  ;;  %v1642_v25 = vpop.f32.mrf.mxu0  ;;  %v1496_v53 = vadd.f32 %v4605_v20, %v1447_v47  ;;  %v1452_v60 = vadd.f32 %v4525_v23, %v1403_v7  ;;  %v1408_v23 = vadd.f32 %v4540_v40, %v4447_v3  ;;  %v3062_v47 = vld [vmem:[#allocation5] sm:$0xff] }
 0x260   :  { %v1549_v28 = vpop.f32.mrf.mxu2 }
 0x263   :  { %v1676_v55 = vpop.f32.mrf.mxu1 }
 0x264   :  { %v1677_v45 = vadd.f32 %v1676_v55, %v1628_v5  ;;  %v1596_v4 = vpop.f32.mrf.mxu3  ;;  %v1545_v55 = vadd.f32 %v1544_v41, %v1496_v53  ;;  %v1413_v53 = vadd.f32 %v4607_v61, %v4447_v3 }
 0x266   :  { %v1716_v48 = vmax.f32 %v1677_v45, 0.0  ;;  %v1645_v52 = vpop.f32.mrf.mxu0 }
 0x268   :  { %v1744_v22 = vpack.c.bf16 %v1716_v48, %v1714_v56  ;;  %v1594_v56 = vadd.f32 %v1593_v21, %v1545_v55  ;;  %v3065_v48 = vld [vmem:[#allocation5 + $0x18] sm:$0xff]  ;;  %v1552_v14 = vpop.f32.mrf.mxu2  ;;  %v1462_v55 = vadd.f32 %v4615_v31, %v1413_v53 }
 0x269   :  { %2083 = vmatpush.bf16.msra.mxu0 %v3065_v48 }
 0x26a   :  { %1951 = vmatmul.bf16.gmra.mxu3 %v1744_v22  ;;  %v1641_v22 = vadd.f32 %v1640_v38, %v1592_v49  ;;  %v1643_v1 = vadd.f32 %v1642_v25, %v1594_v56  ;;  %v3063_v25 = vld [vmem:[#allocation5 + $0x8] sm:$0xff]  ;;  %v1511_v56 = vadd.f32 %v4633_v43, %v1462_v55 }
 0x26b   :  { %v1679_v46 = vpop.f32.mrf.mxu1 }
 0x26c   :  { %v1680_v17 = vadd.f32 %v1679_v46, %v1631_v18  ;;  %v1598_v59 = vpop.f32.mrf.mxu3  ;;  %v1548_v18 = vadd.f32 %v1547_v30, %v4610_v16 }
 0x26e   :  { %v1718_v15 = vmax.f32 %v1680_v17, 0.0  ;;  %v1647_v19 = vpop.f32.mrf.mxu0  ;;  %v1597_v58 = vadd.f32 %v1596_v4, %v1548_v18 }
 0x270   :  { %v1554_v41 = vpop.f32.mrf.mxu2 }
 0x273   :  { %v1681_v51 = vpop.f32.mrf.mxu1 }
 0x274   :  { %v1682_v11 = vadd.f32 %v1681_v51, %v1633_v9  ;;  %v1501_v9 = vadd.f32 %v4617_v26, %v1452_v60  ;;  %v1457_v26 = vadd.f32 %v4542_v44, %v1408_v23 }
 0x276   :  { %v1720_v36 = vmax.f32 %v1682_v11, 0.0  ;;  %v1550_v51 = vadd.f32 %v1549_v28, %v1501_v9  ;;  %v1601_v11 = vpop.f32.mrf.mxu3  ;;  %v1650_v38 = vpop.f32.mrf.mxu0  ;;  %v1506_v42 = vadd.f32 %v4625_v13, %v1457_v26 }
 0x278   :  { %v1746_v34 = vpack.c.bf16 %v1720_v36, %v1718_v15  ;;  %v1599_v15 = vadd.f32 %v1598_v59, %v1550_v51  ;;  %v3064_v36 = vld [vmem:[#allocation5 + $0x10] sm:$0xff]  ;;  %v1557_v30 = vpop.f32.mrf.mxu2 }
 0x279   :  { %2084 = vmatpush.bf16.msra.mxu0 %v3064_v36 }
 0x27a   :  { %1956 = vmatmul.bf16.gmra.mxu3 %v1746_v34  ;;  %v1646_v34 = vadd.f32 %v1645_v52, %v1597_v58  ;;  %v1648_v0 = vadd.f32 %v1647_v19, %v1599_v15  ;;  %v1558_v52 = vadd.f32 %v1557_v30, %v4628_v57 }
 0x27b   :  { %v1684_v27 = vpop.f32.mrf.mxu1 }
 0x27c   :  { %v1685_v29 = vadd.f32 %v1684_v27, %v1636_v39  ;;  %v1553_v39 = vadd.f32 %v1552_v14, %v4620_v24 }
 0x27d   :  { %2085 = vmatpush.bf16.msra.mxu0 %v3063_v25 }
 0x27e   :  { %v1722_v63 = vmax.f32 %v1685_v29, 0.0  ;;  %v1603_v8 = vpop.f32.mrf.mxu3  ;;  %v1555_v29 = vadd.f32 %v1554_v41, %v1506_v42 }
 0x280   :  { %v1559_v6 = vpop.f32.mrf.mxu2 }
 0x281   :  { %2086 = vmatpush.bf16.msra.mxu0 %v3062_v47 }
 0x283   :  { %v1686_v62 = vpop.f32.mrf.mxu1 }
 0x284   :  { %v1687_v2 = vadd.f32 %v1686_v62, %v1638_v33  ;;  %v1652_v62 = vpop.f32.mrf.mxu0 }
 0x286   :  { %v1724_v35 = vmax.f32 %v1687_v2, 0.0  ;;  %v1602_v2 = vadd.f32 %v1601_v11, %v1553_v39  ;;  %v1606_v44 = vpop.f32.mrf.mxu3 }
 0x287   :  { %v1607_v3 = vadd.f32 %v1606_v44, %v1558_v52 }
 0x288   :  { %v1748_v5 = vpack.c.bf16 %v1724_v35, %v1722_v63  ;;  %v1604_v63 = vadd.f32 %v1603_v8, %v1555_v29  ;;  %v1651_v35 = vadd.f32 %v1650_v38, %v1602_v2 }
 0x28a   :  { %1961 = vmatmul.bf16.gmra.mxu3 %v1748_v5  ;;  %v1653_v24 = vadd.f32 %v1652_v62, %v1604_v63 }
 0x28b   :  { %v1689_v45 = vpop.f32.mrf.mxu1 }
 0x28c   :  { %v1690_v12 = vadd.f32 %v1689_v45, %v1641_v22  ;;  %v1655_v28 = vpop.f32.mrf.mxu0  ;;  %v1560_v22 = vadd.f32 %v1559_v6, %v1511_v56 }
 0x28d   :  { %v1656_v14 = vadd.f32 %v1655_v28, %v1607_v3 }
 0x28e   :  { %v1726_v32 = vmax.f32 %v1690_v12, 0.0  ;;  %v1608_v7 = vpop.f32.mrf.mxu3 }
 0x28f   :  { %v1609_v61 = vadd.f32 %v1608_v7, %v1560_v22 }
 0x293   :  { %v1691_v20 = vpop.f32.mrf.mxu1 }
 0x294   :  { %v1692_v46 = vadd.f32 %v1691_v20, %v1643_v1  ;;  %v1898_v1 = vpop.f32.mrf.mxu2  ;;  %v1657_v12 = vpop.f32.mrf.mxu0 }
 0x295   :  { %v1658_v20 = vadd.f32 %v1657_v12, %v1609_v61 }
 0x296   :  { %v1728_v37 = vmax.f32 %v1692_v46, 0.0 }
 0x298   :  { %v1750_v17 = vpack.c.bf16 %v1728_v37, %v1726_v32 }
 0x29a   :  { %1966 = vmatmul.bf16.gmra.mxu3 %v1750_v17  ;;  %v4669_v17 = vld [vmem:[%s4697_s4] ss:$0 sm:$0xff] }
 0x29b   :  { %v1694_v54 = vpop.f32.mrf.mxu1  ;;  %v1899_v51 = vadd.f32 %v4669_v17, %v1898_v1 }
 0x29c   :  { %v1695_v27 = vadd.f32 %v1694_v54, %v1646_v34  ;;  %v1900_v32 = vpop.f32.mrf.mxu2 }
 0x29d   :  { %v1901_v58 = vadd.f32 %v4669_v17, %v1900_v32 }
 0x29e   :  { %v1730_v21 = vmax.f32 %v1695_v27, 0.0 }
 0x2a3   :  { %v1696_v16 = vpop.f32.mrf.mxu1 }
 0x2a4   :  { %v1697_v50 = vadd.f32 %v1696_v16, %v1648_v0  ;;  %v1903_v43 = vpop.f32.mrf.mxu2 }
 0x2a5   :  { %v1904_v27 = vadd.f32 %v4669_v17, %v1903_v43 }
 0x2a6   :  { %v1732_v10 = vmax.f32 %v1697_v50, 0.0 }
 0x2a8   :  { %v1752_v33 = vpack.c.bf16 %v1732_v10, %v1730_v21 }
 0x2aa   :  { %1971 = vmatmul.bf16.gmra.mxu3 %v1752_v33 }
 0x2ab   :  { %v1699_v40 = vpop.f32.mrf.mxu1 }
 0x2ac   :  { %v1700_v4 = vadd.f32 %v1699_v40, %v1651_v35  ;;  %v1905_v18 = vpop.f32.mrf.mxu2 }
 0x2ad   :  { %v1906_v16 = vadd.f32 %v4669_v17, %v1905_v18 }
 0x2ae   :  { %v1734_v45 = vmax.f32 %v1700_v4, 0.0 }
 0x2b3   :  { %v1701_v13 = vpop.f32.mrf.mxu1 }
 0x2b4   :  { %v1702_v5 = vadd.f32 %v1701_v13, %v1653_v24  ;;  %v1908_v54 = vpop.f32.mrf.mxu2 }
 0x2b5   :  { %v1909_v29 = vadd.f32 %v4669_v17, %v1908_v54 }
 0x2b6   :  { %v1736_v49 = vmax.f32 %v1702_v5, 0.0 }
 0x2b8   :  { %v1754_v48 = vpack.c.bf16 %v1736_v49, %v1734_v45 }
 0x2ba   :  { %1976 = vmatmul.bf16.gmra.mxu3 %v1754_v48 }
 0x2bb   :  { %v1704_v59 = vpop.f32.mrf.mxu1 }
 0x2bc   :  { %v1705_v46 = vadd.f32 %v1704_v59, %v1656_v14  ;;  %v1910_v23 = vpop.f32.mrf.mxu2 }
 0x2bd   :  { %v1911_v25 = vadd.f32 %v4669_v17, %v1910_v23 }
 0x2be   :  { %v1738_v37 = vmax.f32 %v1705_v46, 0.0 }
 0x2c3   :  { %v1706_v60 = vpop.f32.mrf.mxu1 }
 0x2c4   :  { %v1707_v31 = vadd.f32 %v1706_v60, %v1658_v20  ;;  %v1913_v21 = vpop.f32.mrf.mxu2 }
 0x2c5   :  { %v1914_v53 = vadd.f32 %v4669_v17, %v1913_v21 }
 0x2c6   :  { %v1740_v19 = vmax.f32 %v1707_v31, 0.0 }
 0x2c8   :  { %v1756_v57 = vpack.c.bf16 %v1740_v19, %v1738_v37 }
 0x2ca   :  { %1981 = vmatmul.bf16.gmra.mxu3 %v1756_v57 }
 0x2cc   :  { %v1915_v33 = vpop.f32.mrf.mxu2 }
 0x2cd   :  { %v1916_v24 = vadd.f32 %v4669_v17, %v1915_v33 }
 0x2d4   :  { %v1918_v44 = vpop.f32.mrf.mxu2 }
 0x2d5   :  { %v1919_v48 = vadd.f32 %v4669_v17, %v1918_v44 }
 0x2dc   :  { %v1920_v13 = vpop.f32.mrf.mxu2 }
 0x2dd   :  { %v1947_v9 = vpop.f32.mrf.mxu3  ;;  %v1921_v22 = vadd.f32 %v4669_v17, %v1920_v13 }
 0x2de   :  { %v1948_v11 = vadd.f32 %v1947_v9, %v1899_v51 }
 0x2e0   :  { %v1987_v36 = vmax.f32 %v1948_v11, 0.0 }
 0x2e4   :  { %v1923_v56 = vpop.f32.mrf.mxu2 }
 0x2e5   :  { %v1949_v41 = vpop.f32.mrf.mxu3  ;;  %v1924_v46 = vadd.f32 %v4669_v17, %v1923_v56 }
 0x2e6   :  { %v1950_v15 = vadd.f32 %v1949_v41, %v1901_v58 }
 0x2e8   :  { %v1988_v34 = vmax.f32 %v1950_v15, 0.0 }
 0x2ea   :  { %v2003_v38 = vpack.c.bf16 %v1988_v34, %v1987_v36 }
 0x2ec   :  { %2087 = vmatmul.bf16.vlgmr.msra.gmra.mxu0 %v2003_v38  ;;  %v1925_v12 = vpop.f32.mrf.mxu2 }
 0x2ed   :  { %v1952_v0 = vpop.f32.mrf.mxu3  ;;  %v1926_v31 = vadd.f32 %v4669_v17, %v1925_v12 }
 0x2ee   :  { %v1953_v50 = vadd.f32 %v1952_v0, %v1904_v27 }
 0x2f0   :  { %v1989_v10 = vmax.f32 %v1953_v50, 0.0 }
 0x2f4   :  { %v1928_v60 = vpop.f32.mrf.mxu2 }
 0x2f5   :  { %v1954_v26 = vpop.f32.mrf.mxu3  ;;  %v1929_v54 = vadd.f32 %v4669_v17, %v1928_v60 }
 0x2f6   :  { %v1955_v8 = vadd.f32 %v1954_v26, %v1906_v16 }
 0x2f8   :  { %v1990_v30 = vmax.f32 %v1955_v8, 0.0 }
 0x2fa   :  { %v2004_v39 = vpack.c.bf16 %v1990_v30, %v1989_v10 }
 0x2fc   :  { %2092 = vmatmul.bf16.gmra.mxu0 %v2004_v39  ;;  %v1930_v9 = vpop.f32.mrf.mxu2 }
 0x2fd   :  { %v1957_v42 = vpop.f32.mrf.mxu3  ;;  %v1931_v58 = vadd.f32 %v4669_v17, %v1930_v9 }
 0x2fe   :  { %v1958_v62 = vadd.f32 %v1957_v42, %v1909_v29  ;;  %v3102_v42 = vld [vmem:[%s4699_s6] ss:$0 sm:$0xff]  ;;  %s3185_s6 = smov [#allocation7]  }
 0x2ff   :  { %s2148_s21 = sshll.u32 %s3185_s6, 4  ;;  %s2149_s21 = int_to_ptr.vmem [resolvable:$true] %s2148_s21 }
 0x300   :  { %v1991_v47 = vmax.f32 %v1958_v62, 0.0 }
 0x304   :  { %v1933_v36 = vpop.f32.mrf.mxu2 }
 0x305   :  { %v1959_v40 = vpop.f32.mrf.mxu3  ;;  %v1934_v16 = vadd.f32 %v4669_v17, %v1933_v36 }
 0x306   :  { %v1960_v2 = vadd.f32 %v1959_v40, %v1911_v25 }
 0x308   :  { %v1992_v63 = vmax.f32 %v1960_v2, 0.0 }
 0x30a   :  { %v2005_v35 = vpack.c.bf16 %v1992_v63, %v1991_v47 }
 0x30c   :  { %2097 = vmatmul.bf16.gmra.mxu0 %v2005_v35  ;;  %v1935_v27 = vpop.f32.mrf.mxu2 }
 0x30d   :  { %v1962_v6 = vpop.f32.mrf.mxu3  ;;  %v1936_v50 = vadd.f32 %v4669_v17, %v1935_v27 }
 0x30e   :  { %v1963_v4 = vadd.f32 %v1962_v6, %v1914_v53 }
 0x310   :  { %v1993_v55 = vmax.f32 %v1963_v4, 0.0 }
 0x315   :  { %v1964_v5 = vpop.f32.mrf.mxu3 }
 0x316   :  { %v1965_v28 = vadd.f32 %v1964_v5, %v1916_v24 }
 0x318   :  { %v1994_v45 = vmax.f32 %v1965_v28, 0.0 }
 0x31a   :  { %v2006_v49 = vpack.c.bf16 %v1994_v45, %v1993_v55 }
 0x31c   :  { %2102 = vmatmul.bf16.gmra.mxu0 %v2006_v49 }
 0x31d   :  { %v1967_v52 = vpop.f32.mrf.mxu3 }
 0x31e   :  { %v1968_v7 = vadd.f32 %v1967_v52, %v1919_v48 }
 0x320   :  { %v1995_v3 = vmax.f32 %v1968_v7, 0.0 }
 0x325   :  { %v1969_v1 = vpop.f32.mrf.mxu3 }
 0x326   :  { %v1970_v59 = vadd.f32 %v1969_v1, %v1921_v22 }
 0x328   :  { %v1996_v61 = vmax.f32 %v1970_v59, 0.0 }
 0x32a   :  { %v2007_v14 = vpack.c.bf16 %v1996_v61, %v1995_v3 }
 0x32c   :  { %2107 = vmatmul.bf16.gmra.mxu0 %v2007_v14 }
 0x32d   :  { %v1972_v20 = vpop.f32.mrf.mxu3 }
 0x32e   :  { %v1973_v32 = vadd.f32 %v1972_v20, %v1924_v46 }
 0x330   :  { %v1997_v57 = vmax.f32 %v1973_v32, 0.0 }
 0x335   :  { %v1974_v37 = vpop.f32.mrf.mxu3 }
 0x336   :  { %v1975_v19 = vadd.f32 %v1974_v37, %v1926_v31 }
 0x338   :  { %v1998_v43 = vmax.f32 %v1975_v19, 0.0 }
 0x33a   :  { %v2008_v18 = vpack.c.bf16 %v1998_v43, %v1997_v57 }
 0x33c   :  { %2112 = vmatmul.bf16.gmra.mxu0 %v2008_v18 }
 0x33d   :  { %v1977_v51 = vpop.f32.mrf.mxu3 }
 0x33e   :  { %v1978_v11 = vadd.f32 %v1977_v51, %v1929_v54 }
 0x340   :  { %v1999_v34 = vmax.f32 %v1978_v11, 0.0 }
 0x345   :  { %v1979_v41 = vpop.f32.mrf.mxu3 }
 0x346   :  { %v1980_v15 = vadd.f32 %v1979_v41, %v1931_v58 }
 0x348   :  { %v2000_v38 = vmax.f32 %v1980_v15, 0.0 }
 0x34a   :  { %v2009_v23 = vpack.c.bf16 %v2000_v38, %v1999_v34 }
 0x34c   :  { %2117 = vmatmul.bf16.gmra.mxu0 %v2009_v23 }
 0x34d   :  { %v1982_v0 = vpop.f32.mrf.mxu3 }
 0x34e   :  { %v1983_v26 = vadd.f32 %v1982_v0, %v1934_v16 }
 0x350   :  { %v2001_v10 = vmax.f32 %v1983_v26, 0.0 }
 0x355   :  { %v1984_v8 = vpop.f32.mrf.mxu3 }
 0x356   :  { %v1985_v21 = vadd.f32 %v1984_v8, %v1936_v50 }
 0x358   :  { %v2002_v30 = vmax.f32 %v1985_v21, 0.0 }
 0x35a   :  { %v2010_v39 = vpack.c.bf16 %v2002_v30, %v2001_v10 }
 0x35c   :  { %2122 = vmatmul.bf16.gmra.mxu0 %v2010_v39 }
 0x369   :  { %v2088_v33 = vpop.f32.mrf.mxu0 }
 0x36a   :  { %v2089_v29 = vadd.f32 %v3102_v42, %v2088_v33 }
 0x36c   :  { %2128 = vst [vmem:[#allocation7] sm:$0xff] %v2089_v29 }
 0x371   :  { %v2090_v25 = vpop.f32.mrf.mxu0 }
 0x372   :  { %v2091_v62 = vadd.f32 %v3102_v42, %v2090_v25 }
 0x374   :  { %2129 = vst [vmem:[#allocation7 + $0x8] sm:$0xff] %v2091_v62 }
 0x379   :  { %v2093_v40 = vpop.f32.mrf.mxu0 }
 0x37a   :  { %v2094_v2 = vadd.f32 %v3102_v42, %v2093_v40 }
 0x37c   :  { %2130 = vst [vmem:[#allocation7 + $0x10] sm:$0xff] %v2094_v2 }
 0x381   :  { %v2095_v17 = vpop.f32.mrf.mxu0 }
 0x382   :  { %v2096_v47 = vadd.f32 %v3102_v42, %v2095_v17 }
 0x384   :  { %2131 = vst [vmem:[#allocation7 + $0x18] sm:$0xff] %v2096_v47 }
 0x389   :  { %v2098_v63 = vpop.f32.mrf.mxu0 }
 0x38a   :  { %v2099_v35 = vadd.f32 %v3102_v42, %v2098_v63 }
 0x38c   :  { %2132 = vst [vmem:[#allocation7 + $0x20] sm:$0xff] %v2099_v35 }
 0x391   :  { %v2100_v44 = vpop.f32.mrf.mxu0 }
 0x392   :  { %v2101_v6 = vadd.f32 %v3102_v42, %v2100_v44 }
 0x394   :  { %2133 = vst [vmem:[#allocation7 + $0x28] sm:$0xff] %v2101_v6 }
 0x399   :  { %v2103_v53 = vpop.f32.mrf.mxu0 }
 0x39a   :  { %v2104_v24 = vadd.f32 %v3102_v42, %v2103_v53 }
 0x39c   :  { %2134 = vst [vmem:[#allocation7 + $0x30] sm:$0xff] %v2104_v24 }
 0x3a1   :  { %v2105_v4 = vpop.f32.mrf.mxu0 }
 0x3a2   :  { %v2106_v13 = vadd.f32 %v3102_v42, %v2105_v4 }
 0x3a4   :  { %2135 = vst [vmem:[#allocation7 + $0x38] sm:$0xff] %v2106_v13 }
 0x3a9   :  { %v2108_v5 = vpop.f32.mrf.mxu0 }
 0x3aa   :  { %v2109_v28 = vadd.f32 %v3102_v42, %v2108_v5 }
 0x3ac   :  { %2136 = vst [vmem:[#allocation7 + $0x40] sm:$0xff] %v2109_v28 }
 0x3b1   :  { %v2110_v55 = vpop.f32.mrf.mxu0 }
 0x3b2   :  { %v2111_v45 = vadd.f32 %v3102_v42, %v2110_v55 }
 0x3b4   :  { %2137 = vst [vmem:[#allocation7 + $0x48] sm:$0xff] %v2111_v45 }
 0x3b9   :  { %v2113_v49 = vpop.f32.mrf.mxu0 }
 0x3ba   :  { %v2114_v52 = vadd.f32 %v3102_v42, %v2113_v49 }
 0x3bc   :  { %2138 = vst [vmem:[#allocation7 + $0x50] sm:$0xff] %v2114_v52 }
 0x3c1   :  { %v2115_v56 = vpop.f32.mrf.mxu0 }
 0x3c2   :  { %v2116_v48 = vadd.f32 %v3102_v42, %v2115_v56 }
 0x3c4   :  { %2139 = vst [vmem:[#allocation7 + $0x58] sm:$0xff] %v2116_v48 }
 0x3c9   :  { %v2118_v22 = vpop.f32.mrf.mxu0 }
 0x3ca   :  { %v2119_v7 = vadd.f32 %v3102_v42, %v2118_v22 }
 0x3cc   :  { %2140 = vst [vmem:[#allocation7 + $0x60] sm:$0xff] %v2119_v7 }
 0x3d1   :  { %v2120_v1 = vpop.f32.mrf.mxu0 }
 0x3d2   :  { %v2121_v59 = vadd.f32 %v3102_v42, %v2120_v1 }
 0x3d4   :  { %2141 = vst [vmem:[#allocation7 + $0x68] sm:$0xff] %v2121_v59 }
 0x3d9   :  { %v2123_v3 = vpop.f32.mrf.mxu0 }
 0x3da   :  { %v2124_v61 = vadd.f32 %v3102_v42, %v2123_v3 }
 0x3dc   :  { %2142 = vst [vmem:[#allocation7 + $0x70] sm:$0xff] %v2124_v61 }
 0x3e1   :  { %v2125_v12 = vpop.f32.mrf.mxu0 }
 0x3e2   :  { %v2126_v14 = vadd.f32 %v3102_v42, %v2125_v12 }
 0x3e4   :  { %2143 = vst [vmem:[#allocation7 + $0x78] sm:$0xff] %v2126_v14 }
 0x3e5   :  { %2156 = dma.vmem_to_hbm [thread:$0]  %s2149_s21, 2048, %s2151_s24, [#allocation4], %s3186_s25, %s3186_s25, %s3187_s26  }
 0x3e6   :  { %3179 = dma.done.wait [#allocation4], 2048  }
 0x3e7   :  { %3180 = vsyncadd [#allocation4], 4294965248 }
 0x3e8   :  { %2161 = vsyncpa [#allocation3], 1 }
 0x3e9   :  { %2162 = vsyncpa [#allocation6], 1 }
 0x3ea   :  { %2163 = vsyncpa [#allocation4], 1 }

</bundles_post_ra>
